<compile_context>
chip_gen: v6e
topology: v6e:2x2x1
jax: 0.10.0
libtpu: 0.0.40
codegen_flags: <defaults>
</compile_context>

<pallas_src>
from functools import partial

import jax
import jax.numpy as jnp
import numpy as np
from jax import lax
from jax.experimental import pallas as pl
from jax.experimental.pallas import tpu as pltpu

_LANES = 128  # lane-dense padded width for the final (T, 2) logits


# ----------------------------- fused Pallas kernel -----------------------------

def _fused_kernel(x_ref, wih1_ref, whh1_ref, b1_ref,
                  wih2_ref, whh2_ref, b2_ref,
                  a1_ref, a2_ref, mask_ref,
                  fc1w_ref, fc1b_ref, bns_ref, bnb_ref,
                  fc2w_ref, fc2b_ref,
                  out_ref, *, T, B, H):
    """Entire forward pass; all intermediates stay resident in VMEM/vregs.

    x_ref    : (T*B, D)   bf16 flattened input (seq-major)
    wih*_ref : (Din, 8H)  bf16 [W_ih_fwd | W_ih_rev], gate cols permuted [i,f,o,g]
    whh*_ref : (H, 8H)    bf16 [W_hh_fwd | W_hh_rev]
    b*_ref   : (1, 8H)    f32  [b_fwd | b_rev]
    a*_ref   : (1, 2H)    attention weights
    mask_ref : (T, T*B)   additive block mask (0 in-block, -1e30 elsewhere)
    fc1w/fc1b: (4H,4H)/(1,4H) ; bns/bnb: folded eval-mode BatchNorm scale/shift
    fc2w/fc2b: (4H,128)/(1,128)  zero / -1e30 padded (lane-dense output)
    out_ref  : (T, 128)   log_softmax logits; wrapper slices [:, :2]
    """
    f32 = jnp.float32
    bf16 = jnp.bfloat16
    H4 = 4 * H
    TB = T * B

    # Direction selector: fwd rows (0:B) take gate cols 0:4H of g, rev rows
    # (B:2B) take cols 4H:8H.  Built once (JAX does not CSE iotas).
    dirmask = lax.broadcasted_iota(jnp.int32, (2 * B, H4), 0) < B

    def recur(px, whh):
        """BiLSTM recurrence given the hoisted input projection.

        px : (T*B, 8H) f32, biases folded, gate layout [i,f,o,g] per direction.
        whh: (H, 8H)   bf16, [whh_fwd | whh_rev].
        Directions stacked on sublanes: state is (2B, H); each step is one
        (2B,H)@(H,8H) MXU push, one vreg select, one sigmoid slab, two tanh.
        Returns Hf, Hb : (T*B, H) fwd / rev hidden states in original time order.
        """
        # Per-step (2B, 4H) gate-preactivation slabs, assembled off the serial
        # path: fwd rows use time t, rev rows use time T-1-t.
        pxs = [jnp.concatenate([px[t * B:(t + 1) * B, 0:H4],
                                px[(T - 1 - t) * B:(T - t) * B, H4:2 * H4]],
                               axis=0) for t in range(T)]
        c = jnp.zeros((2 * B, H), f32)
        h = jnp.zeros((2 * B, H), f32)
        hs = []
        for t in range(T):                       # static full unroll (T small & static)
            if t == 0:
                gc = pxs[0]                      # h0 == 0 -> skip recurrent matmul
            else:
                g = jnp.dot(h.astype(bf16), whh, preferred_element_type=f32)   # (2B, 8H)
                gc = jnp.where(dirmask, g[:, 0:H4], g[:, H4:2 * H4]) + pxs[t]
            # Gate layout [i, f, o, g]: one sigmoid slab + one tanh slab (f32).
            s = jax.nn.sigmoid(gc[:, 0:3 * H])
            gg = jnp.tanh(gc[:, 3 * H:4 * H])
            if t == 0:
                c = s[:, 0:H] * gg               # c0 == 0
            else:
                c = s[:, H:2 * H] * c + s[:, 0:H] * gg
            h = s[:, 2 * H:3 * H] * jnp.tanh(c)
            hs.append(h)
        # Assemble per-direction time-major outputs once; downstream consumers
        # use split-K instead of a lane concat of [Hf | Hb].
        Hf = jnp.concatenate([hs[t][0:B] for t in range(T)], axis=0)            # (T*B, H)
        Hb = jnp.concatenate([hs[T - 1 - t][B:2 * B] for t in range(T)], axis=0)
        return Hf, Hb

    def attention(Hf, Hb, w):
        # As written in the module: softmax over the *batch* axis for every t,
        # expressed as one masked softmax (precomputed additive block mask) +
        # two split-K MXU matmuls.  Kept f32 (off the serial path).
        sf = lax.dot_general(w[:, 0:H], Hf, (((1,), (1,)), ((), ())),
                             preferred_element_type=f32)                        # (1, T*B)
        sb = lax.dot_general(w[:, H:2 * H], Hb, (((1,), (1,)), ((), ())),
                             preferred_element_type=f32)
        s = jnp.maximum(sf + sb, 0.0)                                           # ReLU(scores)
        masked = jnp.broadcast_to(s, (T, TB)) + mask_ref[...]
        m = jnp.max(masked, axis=-1, keepdims=True)
        e = jnp.exp(masked - m)
        attn = e / jnp.sum(e, axis=-1, keepdims=True)
        return (jnp.dot(attn, Hf, preferred_element_type=f32),
                jnp.dot(attn, Hb, preferred_element_type=f32))                  # (T, H) x2

    # ---- layer 1: hoisted input projection (one MXU matmul for all T, both dirs)
    px1 = jnp.dot(x_ref[...], wih1_ref[...], preferred_element_type=f32) + b1_ref[...]
    Hf1, Hb1 = recur(px1, whh1_ref[...])
    x1f, x1b = attention(Hf1, Hb1, a1_ref[...])

    # ---- layer 2: split-K input projection (no lane concat of [Hf1 | Hb1])
    wih2 = wih2_ref[...]
    px2 = (jnp.dot(Hf1.astype(bf16), wih2[0:H, :], preferred_element_type=f32)
           + jnp.dot(Hb1.astype(bf16), wih2[H:2 * H, :], preferred_element_type=f32)
           + b2_ref[...])
    Hf2, Hb2 = recur(px2, whh2_ref[...])
    yf, yb = attention(Hf2, Hb2, a2_ref[...])

    # ---- head: Linear -> folded eval BatchNorm -> ReLU -> Linear -> log_softmax
    # split-K over the four (T, H) attention halves instead of lane concats;
    # kept f32 (one-shot epilogue, protects output numerics).
    fc1w = fc1w_ref[...]
    hid = (jnp.dot(x1f, fc1w[0:H, :], preferred_element_type=f32)
           + jnp.dot(x1b, fc1w[H:2 * H, :], preferred_element_type=f32)
           + jnp.dot(yf, fc1w[2 * H:3 * H, :], preferred_element_type=f32)
           + jnp.dot(yb, fc1w[3 * H:4 * H, :], preferred_element_type=f32)
           + fc1b_ref[...])
    hid = jnp.maximum(hid * bns_ref[...] + bnb_ref[...], 0.0)
    logits = jnp.dot(hid, fc2w_ref[...], preferred_element_type=f32) + fc2b_ref[...]   # (T, 128)
    m = jnp.max(logits, axis=-1, keepdims=True)
    lse = jnp.log(jnp.sum(jnp.exp(logits - m), axis=-1, keepdims=True)) + m
    out_ref[...] = logits - lse            # padded columns (bias -1e30) don't affect lse


# ------------------------------ wrapper ------------------------------

def _permute_gates(w):
    """Reorder (…, 4H) gate columns from PyTorch [i,f,g,o] to [i,f,o,g] so the
    three sigmoid gates are lane-contiguous and tanh(g) is last."""
    i, f, g, o = jnp.split(w, 4, axis=-1)
    return jnp.concatenate([i, f, o, g], axis=-1)


def _pack_bilstm(lp):
    wih = jnp.concatenate([_permute_gates(lp["wih_f"]),
                           _permute_gates(lp["wih_r"])], axis=1).astype(jnp.bfloat16)
    whh = jnp.concatenate([_permute_gates(lp["whh_f"]),
                           _permute_gates(lp["whh_r"])], axis=1).astype(jnp.bfloat16)
    b = jnp.concatenate([_permute_gates(lp["b_f"]),
                         _permute_gates(lp["b_r"])], axis=1)                    # f32
    return wih, whh, b


def forward(x, p):
    T, B, D = x.shape
    H = p["lstm1"]["whh_f"].shape[0]
    NC = p["fc2_w"].shape[1]  # 2 classes

    x_flat = x.reshape(T * B, D).astype(jnp.bfloat16)
    wih1, whh1, b1 = _pack_bilstm(p["lstm1"])
    wih2, whh2, b2 = _pack_bilstm(p["lstm2"])

    # Fold eval-mode BatchNorm into a per-channel affine.
    bn_scale = p["bn_gamma"] * lax.rsqrt(p["bn_var"] + 1e-5)
    bn_shift = p["bn_beta"] - p["bn_mean"] * bn_scale

    # Pad the classifier to 128 lanes: zero weights, -1e30 bias in padded
    # columns so they never contribute to log_softmax; output is lane-dense.
    fc2_w = jnp.zeros((p["fc2_w"].shape[0], _LANES), jnp.float32).at[:, :NC].set(p["fc2_w"])
    fc2_b = jnp.full((1, _LANES), -1e30, jnp.float32).at[:, :NC].set(p["fc2_b"])

    # Additive block mask for the softmax-over-batch attention (precomputed
    # once here instead of iota/compare/select chains inside the kernel).
    row = jnp.arange(T)[:, None]
    col = jnp.arange(T * B)[None, :]
    mask_add = jnp.where((col >= row * B) & (col < (row + 1) * B),
                         0.0, -1e30).astype(jnp.float32)

    vmem = pl.BlockSpec(memory_space=pltpu.MemorySpace.VMEM)
    out = pl.pallas_call(
        partial(_fused_kernel, T=T, B=B, H=H),
        out_shape=jax.ShapeDtypeStruct((T, _LANES), jnp.float32),
        in_specs=[vmem] * 16,
        out_specs=vmem,
    )(x_flat, wih1, whh1, b1, wih2, whh2, b2,
      p["att1_w"], p["att2_w"], mask_add,
      p["fc1_w"], p["fc1_b"], bn_scale, bn_shift, fc2_w, fc2_b)
    return out[:, :NC]


# --------------------------- pure-JAX reference ---------------------------

def _lstm_dir_ref(x, wih, whh, b):
    H = whh.shape[0]
    B = x.shape[1]

    def step(carry, x_t):
        h, c = carry
        g = x_t @ wih + h @ whh + b
        i = jax.nn.sigmoid(g[:, :H])
        f = jax.nn.sigmoid(g[:, H:2 * H])
        gg = jnp.tanh(g[:, 2 * H:3 * H])
        o = jax.nn.sigmoid(g[:, 3 * H:])
        c = f * c + i * gg
        h = o * jnp.tanh(c)
        return (h, c), h

    _, hs = lax.scan(step, (jnp.zeros((B, H)), jnp.zeros((B, H))), x)
    return hs


def _bidir_lstm_ref(x, p):
    f = _lstm_dir_ref(x, p["wih_f"], p["whh_f"], p["b_f"])
    r = _lstm_dir_ref(x[::-1], p["wih_r"], p["whh_r"], p["b_r"])[::-1]
    return jnp.concatenate([f, r], axis=-1)


def _attention_ref(x, w):
    scores = jnp.maximum(jnp.einsum("tbd,d->tb", x, w[0]), 0.0)
    attn = jax.nn.softmax(scores, axis=-1)
    attn = attn / jnp.sum(attn, axis=-1, keepdims=True)
    return jnp.sum(x * attn[:, :, None], axis=1)


def _head_ref(z, p):
    h = z @ p["fc1_w"] + p["fc1_b"]
    h = (h - p["bn_mean"]) * lax.rsqrt(p["bn_var"] + 1e-5) * p["bn_gamma"] + p["bn_beta"]
    h = jnp.maximum(h, 0.0)
    logits = h @ p["fc2_w"] + p["fc2_b"]
    return jax.nn.log_softmax(logits, axis=1)


def forward_ref(x, p):
    out1 = _bidir_lstm_ref(x, p["lstm1"])
    x1 = _attention_ref(out1, p["att1_w"])
    out2 = _bidir_lstm_ref(out1, p["lstm2"])
    y = _attention_ref(out2, p["att2_w"])
    z = jnp.concatenate([x1, y], axis=1)
    return _head_ref(z, p)


# ------------------------------ param init ------------------------------

def _uniform(key, shape, scale):
    return jax.random.uniform(key, shape, jnp.float32, -scale, scale)


def _lstm_params(key, d_in, H):
    ks = jax.random.split(key, 6)
    s = 1.0 / np.sqrt(H)
    return dict(
        wih_f=_uniform(ks[0], (d_in, 4 * H), s),
        whh_f=_uniform(ks[1], (H, 4 * H), s),
        b_f=_uniform(ks[2], (1, 4 * H), s),
        wih_r=_uniform(ks[3], (d_in, 4 * H), s),
        whh_r=_uniform(ks[4], (H, 4 * H), s),
        b_r=_uniform(ks[5], (1, 4 * H), s),
    )


def init_params(key, d_in, H):
    ks = jax.random.split(key, 8)
    s_att = 1.0 / np.sqrt(2 * H)
    s_fc = 1.0 / np.sqrt(4 * H)
    return dict(
        lstm1=_lstm_params(ks[0], d_in, H),
        lstm2=_lstm_params(ks[1], 2 * H, H),
        att1_w=_uniform(ks[2], (1, 2 * H), s_att),
        att2_w=_uniform(ks[3], (1, 2 * H), s_att),
        fc1_w=_uniform(ks[4], (4 * H, 4 * H), s_fc),
        fc1_b=_uniform(ks[5], (1, 4 * H), s_fc),
        bn_gamma=jnp.ones((1, 4 * H), jnp.float32),
        bn_beta=jnp.zeros((1, 4 * H), jnp.float32),
        bn_mean=jnp.zeros((1, 4 * H), jnp.float32),
        bn_var=jnp.ones((1, 4 * H), jnp.float32),
        fc2_w=_uniform(ks[6], (4 * H, 2), s_fc),
        fc2_b=_uniform(ks[7], (1, 2), s_fc),
    )


# --------------------------------- main ---------------------------------

if __name__ == "__main__":
    hparams = dict(static_features=["s0", "s1"], dynamic_features=["d0", "d1"],
                   hidden_size=32, lstm_layers=1)
    d_in = len(hparams["static_features"]) + len(hparams["dynamic_features"])
    H = hparams["hidden_size"]
    T, B = 8, 4                      # seq_len, batch

    key = jax.random.PRNGKey(0)
    kx, kp = jax.random.split(key)
    x = jax.random.normal(kx, (T, B, d_in), jnp.float32)
    params = init_params(kp, d_in, H)

    out = jax.jit(forward)(x, params)
    out = jax.block_until_ready(out)

    ref = forward_ref(x, params)
    # 2e-2 tolerance: kernel uses bf16 MXU operands (f32 accumulate) on the
    # LSTM matmuls per the performance review; reference is pure f32.
    np.testing.assert_allclose(np.asarray(out), np.asarray(ref), rtol=2e-2, atol=2e-2)
    assert out.shape == (T, 2)

    print("KERNEL_OK")
</pallas_src>

<mosaic_0001>
module attributes {stable_mosaic.version = 11 : i64} {
  func.func @_fused_kernel(%arg0: memref<32x4xbf16, #tpu.memory_space<vmem>>, %arg1: memref<4x256xbf16, #tpu.memory_space<vmem>>, %arg2: memref<32x256xbf16, #tpu.memory_space<vmem>>, %arg3: memref<1x256xf32, #tpu.memory_space<vmem>>, %arg4: memref<64x256xbf16, #tpu.memory_space<vmem>>, %arg5: memref<32x256xbf16, #tpu.memory_space<vmem>>, %arg6: memref<1x256xf32, #tpu.memory_space<vmem>>, %arg7: memref<1x64xf32, #tpu.memory_space<vmem>>, %arg8: memref<1x64xf32, #tpu.memory_space<vmem>>, %arg9: memref<8x32xf32, #tpu.memory_space<vmem>>, %arg10: memref<128x128xf32, #tpu.memory_space<vmem>>, %arg11: memref<1x128xf32, #tpu.memory_space<vmem>>, %arg12: memref<1x128xf32, #tpu.memory_space<vmem>>, %arg13: memref<1x128xf32, #tpu.memory_space<vmem>>, %arg14: memref<128x128xf32, #tpu.memory_space<vmem>>, %arg15: memref<1x128xf32, #tpu.memory_space<vmem>>, %arg16: memref<8x128xf32, #tpu.memory_space<vmem>>) attributes {dimension_semantics = [], scalar_prefetch = 0 : i64, scratch_operands = 0 : i64, tpu.core_type = #tpu.core_type<tc>} {
    %0 = tpu.iota {dimensions = array<i32: 0>} : vector<8x128xi32>
    %c4_i32 = arith.constant 4 : i32
    %1 = vector.broadcast %c4_i32 : i32 to vector<8x128xi32>
    %2 = arith.cmpi slt, %0, %1 : vector<8x128xi32>
    %c0 = arith.constant 0 : index
    %c0_0 = arith.constant 0 : index
    %3 = vector.load %arg0[%c0, %c0_0] : memref<32x4xbf16, #tpu.memory_space<vmem>>, vector<32x4xbf16>
    %c0_1 = arith.constant 0 : index
    %c0_2 = arith.constant 0 : index
    %4 = vector.load %arg1[%c0_1, %c0_2] : memref<4x256xbf16, #tpu.memory_space<vmem>>, vector<4x256xbf16>
    %cst = arith.constant dense<0.000000e+00> : vector<32x256xf32>
    %5 = tpu.matmul %3, %4, %cst {dimension_numbers = #tpu.dot_dimension_numbers<[1], [0], [0], [1], [0, 0, 1, 1], [], []>} : vector<32x4xbf16>, vector<4x256xbf16>, vector<32x256xf32> -> vector<32x256xf32>
    %c0_3 = arith.constant 0 : index
    %c0_4 = arith.constant 0 : index
    %6 = vector.load %arg3[%c0_3, %c0_4] : memref<1x256xf32, #tpu.memory_space<vmem>>, vector<1x256xf32>
    %7 = vector.broadcast %6 : vector<1x256xf32> to vector<32x256xf32>
    %8 = arith.addf %5, %7 : vector<32x256xf32>
    %c0_5 = arith.constant 0 : index
    %c0_6 = arith.constant 0 : index
    %9 = vector.load %arg2[%c0_5, %c0_6] : memref<32x256xbf16, #tpu.memory_space<vmem>>, vector<32x256xbf16>
    %10 = vector.extract_strided_slice %8 {offsets = [0, 0], sizes = [4, 128], strides = [1, 1]} : vector<32x256xf32> to vector<4x128xf32>
    %11 = vector.extract_strided_slice %8 {offsets = [28, 128], sizes = [4, 128], strides = [1, 1]} : vector<32x256xf32> to vector<4x128xf32>
    %12 = tpu.concatenate %10, %11 in 0 : vector<4x128xf32>, vector<4x128xf32> -> vector<8x128xf32>
    %13 = vector.extract_strided_slice %8 {offsets = [4, 0], sizes = [4, 128], strides = [1, 1]} : vector<32x256xf32> to vector<4x128xf32>
    %14 = vector.extract_strided_slice %8 {offsets = [24, 128], sizes = [4, 128], strides = [1, 1]} : vector<32x256xf32> to vector<4x128xf32>
    %15 = tpu.concatenate %13, %14 in 0 : vector<4x128xf32>, vector<4x128xf32> -> vector<8x128xf32>
    %16 = vector.extract_strided_slice %8 {offsets = [8, 0], sizes = [4, 128], strides = [1, 1]} : vector<32x256xf32> to vector<4x128xf32>
    %17 = vector.extract_strided_slice %8 {offsets = [20, 128], sizes = [4, 128], strides = [1, 1]} : vector<32x256xf32> to vector<4x128xf32>
    %18 = tpu.concatenate %16, %17 in 0 : vector<4x128xf32>, vector<4x128xf32> -> vector<8x128xf32>
    %19 = vector.extract_strided_slice %8 {offsets = [12, 0], sizes = [4, 128], strides = [1, 1]} : vector<32x256xf32> to vector<4x128xf32>
    %20 = vector.extract_strided_slice %8 {offsets = [16, 128], sizes = [4, 128], strides = [1, 1]} : vector<32x256xf32> to vector<4x128xf32>
    %21 = tpu.concatenate %19, %20 in 0 : vector<4x128xf32>, vector<4x128xf32> -> vector<8x128xf32>
    %22 = vector.extract_strided_slice %8 {offsets = [16, 0], sizes = [4, 128], strides = [1, 1]} : vector<32x256xf32> to vector<4x128xf32>
    %23 = vector.extract_strided_slice %8 {offsets = [12, 128], sizes = [4, 128], strides = [1, 1]} : vector<32x256xf32> to vector<4x128xf32>
    %24 = tpu.concatenate %22, %23 in 0 : vector<4x128xf32>, vector<4x128xf32> -> vector<8x128xf32>
    %25 = vector.extract_strided_slice %8 {offsets = [20, 0], sizes = [4, 128], strides = [1, 1]} : vector<32x256xf32> to vector<4x128xf32>
    %26 = vector.extract_strided_slice %8 {offsets = [8, 128], sizes = [4, 128], strides = [1, 1]} : vector<32x256xf32> to vector<4x128xf32>
    %27 = tpu.concatenate %25, %26 in 0 : vector<4x128xf32>, vector<4x128xf32> -> vector<8x128xf32>
    %28 = vector.extract_strided_slice %8 {offsets = [24, 0], sizes = [4, 128], strides = [1, 1]} : vector<32x256xf32> to vector<4x128xf32>
    %29 = vector.extract_strided_slice %8 {offsets = [4, 128], sizes = [4, 128], strides = [1, 1]} : vector<32x256xf32> to vector<4x128xf32>
    %30 = tpu.concatenate %28, %29 in 0 : vector<4x128xf32>, vector<4x128xf32> -> vector<8x128xf32>
    %31 = vector.extract_strided_slice %8 {offsets = [28, 0], sizes = [4, 128], strides = [1, 1]} : vector<32x256xf32> to vector<4x128xf32>
    %32 = vector.extract_strided_slice %8 {offsets = [0, 128], sizes = [4, 128], strides = [1, 1]} : vector<32x256xf32> to vector<4x128xf32>
    %33 = tpu.concatenate %31, %32 in 0 : vector<4x128xf32>, vector<4x128xf32> -> vector<8x128xf32>
    %34 = vector.extract_strided_slice %12 {offsets = [0, 0], sizes = [8, 96], strides = [1, 1]} : vector<8x128xf32> to vector<8x96xf32>
    %35 = arith.negf %34 : vector<8x96xf32>
    %36 = math.exp %35 : vector<8x96xf32>
    %cst_7 = arith.constant 1.000000e+00 : f32
    %37 = vector.broadcast %cst_7 : f32 to vector<8x96xf32>
    %38 = arith.addf %37, %36 : vector<8x96xf32>
    %39 = arith.divf %37, %38 : vector<8x96xf32>
    %40 = vector.extract_strided_slice %12 {offsets = [0, 96], sizes = [8, 32], strides = [1, 1]} : vector<8x128xf32> to vector<8x32xf32>
    %41 = math.tanh %40 : vector<8x32xf32>
    %42 = vector.extract_strided_slice %39 {offsets = [0, 0], sizes = [8, 32], strides = [1, 1]} : vector<8x96xf32> to vector<8x32xf32>
    %43 = arith.mulf %42, %41 : vector<8x32xf32>
    %44 = vector.extract_strided_slice %39 {offsets = [0, 64], sizes = [8, 32], strides = [1, 1]} : vector<8x96xf32> to vector<8x32xf32>
    %45 = math.tanh %43 : vector<8x32xf32>
    %46 = arith.mulf %44, %45 : vector<8x32xf32>
    %47 = arith.truncf %46 : vector<8x32xf32> to vector<8x32xbf16>
    %cst_8 = arith.constant dense<0.000000e+00> : vector<8x256xf32>
    %48 = tpu.matmul %47, %9, %cst_8 {dimension_numbers = #tpu.dot_dimension_numbers<[1], [0], [0], [1], [0, 0, 1, 1], [], []>} : vector<8x32xbf16>, vector<32x256xbf16>, vector<8x256xf32> -> vector<8x256xf32>
    %49 = vector.extract_strided_slice %48 {offsets = [0, 0], sizes = [8, 128], strides = [1, 1]} : vector<8x256xf32> to vector<8x128xf32>
    %50 = vector.extract_strided_slice %48 {offsets = [0, 128], sizes = [8, 128], strides = [1, 1]} : vector<8x256xf32> to vector<8x128xf32>
    %51 = arith.select %2, %49, %50 : vector<8x128xi1>, vector<8x128xf32>
    %52 = arith.addf %51, %15 : vector<8x128xf32>
    %53 = vector.extract_strided_slice %52 {offsets = [0, 0], sizes = [8, 96], strides = [1, 1]} : vector<8x128xf32> to vector<8x96xf32>
    %54 = arith.negf %53 : vector<8x96xf32>
    %55 = math.exp %54 : vector<8x96xf32>
    %cst_9 = arith.constant 1.000000e+00 : f32
    %56 = vector.broadcast %cst_9 : f32 to vector<8x96xf32>
    %57 = arith.addf %56, %55 : vector<8x96xf32>
    %58 = arith.divf %56, %57 : vector<8x96xf32>
    %59 = vector.extract_strided_slice %52 {offsets = [0, 96], sizes = [8, 32], strides = [1, 1]} : vector<8x128xf32> to vector<8x32xf32>
    %60 = math.tanh %59 : vector<8x32xf32>
    %61 = vector.extract_strided_slice %58 {offsets = [0, 32], sizes = [8, 32], strides = [1, 1]} : vector<8x96xf32> to vector<8x32xf32>
    %62 = arith.mulf %61, %43 : vector<8x32xf32>
    %63 = vector.extract_strided_slice %58 {offsets = [0, 0], sizes = [8, 32], strides = [1, 1]} : vector<8x96xf32> to vector<8x32xf32>
    %64 = arith.mulf %63, %60 : vector<8x32xf32>
    %65 = arith.addf %62, %64 : vector<8x32xf32>
    %66 = vector.extract_strided_slice %58 {offsets = [0, 64], sizes = [8, 32], strides = [1, 1]} : vector<8x96xf32> to vector<8x32xf32>
    %67 = math.tanh %65 : vector<8x32xf32>
    %68 = arith.mulf %66, %67 : vector<8x32xf32>
    %69 = arith.truncf %68 : vector<8x32xf32> to vector<8x32xbf16>
    %cst_10 = arith.constant dense<0.000000e+00> : vector<8x256xf32>
    %70 = tpu.matmul %69, %9, %cst_10 {dimension_numbers = #tpu.dot_dimension_numbers<[1], [0], [0], [1], [0, 0, 1, 1], [], []>} : vector<8x32xbf16>, vector<32x256xbf16>, vector<8x256xf32> -> vector<8x256xf32>
    %71 = vector.extract_strided_slice %70 {offsets = [0, 0], sizes = [8, 128], strides = [1, 1]} : vector<8x256xf32> to vector<8x128xf32>
    %72 = vector.extract_strided_slice %70 {offsets = [0, 128], sizes = [8, 128], strides = [1, 1]} : vector<8x256xf32> to vector<8x128xf32>
    %73 = arith.select %2, %71, %72 : vector<8x128xi1>, vector<8x128xf32>
    %74 = arith.addf %73, %18 : vector<8x128xf32>
    %75 = vector.extract_strided_slice %74 {offsets = [0, 0], sizes = [8, 96], strides = [1, 1]} : vector<8x128xf32> to vector<8x96xf32>
    %76 = arith.negf %75 : vector<8x96xf32>
    %77 = math.exp %76 : vector<8x96xf32>
    %cst_11 = arith.constant 1.000000e+00 : f32
    %78 = vector.broadcast %cst_11 : f32 to vector<8x96xf32>
    %79 = arith.addf %78, %77 : vector<8x96xf32>
    %80 = arith.divf %78, %79 : vector<8x96xf32>
    %81 = vector.extract_strided_slice %74 {offsets = [0, 96], sizes = [8, 32], strides = [1, 1]} : vector<8x128xf32> to vector<8x32xf32>
    %82 = math.tanh %81 : vector<8x32xf32>
    %83 = vector.extract_strided_slice %80 {offsets = [0, 32], sizes = [8, 32], strides = [1, 1]} : vector<8x96xf32> to vector<8x32xf32>
    %84 = arith.mulf %83, %65 : vector<8x32xf32>
    %85 = vector.extract_strided_slice %80 {offsets = [0, 0], sizes = [8, 32], strides = [1, 1]} : vector<8x96xf32> to vector<8x32xf32>
    %86 = arith.mulf %85, %82 : vector<8x32xf32>
    %87 = arith.addf %84, %86 : vector<8x32xf32>
    %88 = vector.extract_strided_slice %80 {offsets = [0, 64], sizes = [8, 32], strides = [1, 1]} : vector<8x96xf32> to vector<8x32xf32>
    %89 = math.tanh %87 : vector<8x32xf32>
    %90 = arith.mulf %88, %89 : vector<8x32xf32>
    %91 = arith.truncf %90 : vector<8x32xf32> to vector<8x32xbf16>
    %cst_12 = arith.constant dense<0.000000e+00> : vector<8x256xf32>
    %92 = tpu.matmul %91, %9, %cst_12 {dimension_numbers = #tpu.dot_dimension_numbers<[1], [0], [0], [1], [0, 0, 1, 1], [], []>} : vector<8x32xbf16>, vector<32x256xbf16>, vector<8x256xf32> -> vector<8x256xf32>
    %93 = vector.extract_strided_slice %92 {offsets = [0, 0], sizes = [8, 128], strides = [1, 1]} : vector<8x256xf32> to vector<8x128xf32>
    %94 = vector.extract_strided_slice %92 {offsets = [0, 128], sizes = [8, 128], strides = [1, 1]} : vector<8x256xf32> to vector<8x128xf32>
    %95 = arith.select %2, %93, %94 : vector<8x128xi1>, vector<8x128xf32>
    %96 = arith.addf %95, %21 : vector<8x128xf32>
    %97 = vector.extract_strided_slice %96 {offsets = [0, 0], sizes = [8, 96], strides = [1, 1]} : vector<8x128xf32> to vector<8x96xf32>
    %98 = arith.negf %97 : vector<8x96xf32>
    %99 = math.exp %98 : vector<8x96xf32>
    %cst_13 = arith.constant 1.000000e+00 : f32
    %100 = vector.broadcast %cst_13 : f32 to vector<8x96xf32>
    %101 = arith.addf %100, %99 : vector<8x96xf32>
    %102 = arith.divf %100, %101 : vector<8x96xf32>
    %103 = vector.extract_strided_slice %96 {offsets = [0, 96], sizes = [8, 32], strides = [1, 1]} : vector<8x128xf32> to vector<8x32xf32>
    %104 = math.tanh %103 : vector<8x32xf32>
    %105 = vector.extract_strided_slice %102 {offsets = [0, 32], sizes = [8, 32], strides = [1, 1]} : vector<8x96xf32> to vector<8x32xf32>
    %106 = arith.mulf %105, %87 : vector<8x32xf32>
    %107 = vector.extract_strided_slice %102 {offsets = [0, 0], sizes = [8, 32], strides = [1, 1]} : vector<8x96xf32> to vector<8x32xf32>
    %108 = arith.mulf %107, %104 : vector<8x32xf32>
    %109 = arith.addf %106, %108 : vector<8x32xf32>
    %110 = vector.extract_strided_slice %102 {offsets = [0, 64], sizes = [8, 32], strides = [1, 1]} : vector<8x96xf32> to vector<8x32xf32>
    %111 = math.tanh %109 : vector<8x32xf32>
    %112 = arith.mulf %110, %111 : vector<8x32xf32>
    %113 = arith.truncf %112 : vector<8x32xf32> to vector<8x32xbf16>
    %cst_14 = arith.constant dense<0.000000e+00> : vector<8x256xf32>
    %114 = tpu.matmul %113, %9, %cst_14 {dimension_numbers = #tpu.dot_dimension_numbers<[1], [0], [0], [1], [0, 0, 1, 1], [], []>} : vector<8x32xbf16>, vector<32x256xbf16>, vector<8x256xf32> -> vector<8x256xf32>
    %115 = vector.extract_strided_slice %114 {offsets = [0, 0], sizes = [8, 128], strides = [1, 1]} : vector<8x256xf32> to vector<8x128xf32>
    %116 = vector.extract_strided_slice %114 {offsets = [0, 128], sizes = [8, 128], strides = [1, 1]} : vector<8x256xf32> to vector<8x128xf32>
    %117 = arith.select %2, %115, %116 : vector<8x128xi1>, vector<8x128xf32>
    %118 = arith.addf %117, %24 : vector<8x128xf32>
    %119 = vector.extract_strided_slice %118 {offsets = [0, 0], sizes = [8, 96], strides = [1, 1]} : vector<8x128xf32> to vector<8x96xf32>
    %120 = arith.negf %119 : vector<8x96xf32>
    %121 = math.exp %120 : vector<8x96xf32>
    %cst_15 = arith.constant 1.000000e+00 : f32
    %122 = vector.broadcast %cst_15 : f32 to vector<8x96xf32>
    %123 = arith.addf %122, %121 : vector<8x96xf32>
    %124 = arith.divf %122, %123 : vector<8x96xf32>
    %125 = vector.extract_strided_slice %118 {offsets = [0, 96], sizes = [8, 32], strides = [1, 1]} : vector<8x128xf32> to vector<8x32xf32>
    %126 = math.tanh %125 : vector<8x32xf32>
    %127 = vector.extract_strided_slice %124 {offsets = [0, 32], sizes = [8, 32], strides = [1, 1]} : vector<8x96xf32> to vector<8x32xf32>
    %128 = arith.mulf %127, %109 : vector<8x32xf32>
    %129 = vector.extract_strided_slice %124 {offsets = [0, 0], sizes = [8, 32], strides = [1, 1]} : vector<8x96xf32> to vector<8x32xf32>
    %130 = arith.mulf %129, %126 : vector<8x32xf32>
    %131 = arith.addf %128, %130 : vector<8x32xf32>
    %132 = vector.extract_strided_slice %124 {offsets = [0, 64], sizes = [8, 32], strides = [1, 1]} : vector<8x96xf32> to vector<8x32xf32>
    %133 = math.tanh %131 : vector<8x32xf32>
    %134 = arith.mulf %132, %133 : vector<8x32xf32>
    %135 = arith.truncf %134 : vector<8x32xf32> to vector<8x32xbf16>
    %cst_16 = arith.constant dense<0.000000e+00> : vector<8x256xf32>
    %136 = tpu.matmul %135, %9, %cst_16 {dimension_numbers = #tpu.dot_dimension_numbers<[1], [0], [0], [1], [0, 0, 1, 1], [], []>} : vector<8x32xbf16>, vector<32x256xbf16>, vector<8x256xf32> -> vector<8x256xf32>
    %137 = vector.extract_strided_slice %136 {offsets = [0, 0], sizes = [8, 128], strides = [1, 1]} : vector<8x256xf32> to vector<8x128xf32>
    %138 = vector.extract_strided_slice %136 {offsets = [0, 128], sizes = [8, 128], strides = [1, 1]} : vector<8x256xf32> to vector<8x128xf32>
    %139 = arith.select %2, %137, %138 : vector<8x128xi1>, vector<8x128xf32>
    %140 = arith.addf %139, %27 : vector<8x128xf32>
    %141 = vector.extract_strided_slice %140 {offsets = [0, 0], sizes = [8, 96], strides = [1, 1]} : vector<8x128xf32> to vector<8x96xf32>
    %142 = arith.negf %141 : vector<8x96xf32>
    %143 = math.exp %142 : vector<8x96xf32>
    %cst_17 = arith.constant 1.000000e+00 : f32
    %144 = vector.broadcast %cst_17 : f32 to vector<8x96xf32>
    %145 = arith.addf %144, %143 : vector<8x96xf32>
    %146 = arith.divf %144, %145 : vector<8x96xf32>
    %147 = vector.extract_strided_slice %140 {offsets = [0, 96], sizes = [8, 32], strides = [1, 1]} : vector<8x128xf32> to vector<8x32xf32>
    %148 = math.tanh %147 : vector<8x32xf32>
    %149 = vector.extract_strided_slice %146 {offsets = [0, 32], sizes = [8, 32], strides = [1, 1]} : vector<8x96xf32> to vector<8x32xf32>
    %150 = arith.mulf %149, %131 : vector<8x32xf32>
    %151 = vector.extract_strided_slice %146 {offsets = [0, 0], sizes = [8, 32], strides = [1, 1]} : vector<8x96xf32> to vector<8x32xf32>
    %152 = arith.mulf %151, %148 : vector<8x32xf32>
    %153 = arith.addf %150, %152 : vector<8x32xf32>
    %154 = vector.extract_strided_slice %146 {offsets = [0, 64], sizes = [8, 32], strides = [1, 1]} : vector<8x96xf32> to vector<8x32xf32>
    %155 = math.tanh %153 : vector<8x32xf32>
    %156 = arith.mulf %154, %155 : vector<8x32xf32>
    %157 = arith.truncf %156 : vector<8x32xf32> to vector<8x32xbf16>
    %cst_18 = arith.constant dense<0.000000e+00> : vector<8x256xf32>
    %158 = tpu.matmul %157, %9, %cst_18 {dimension_numbers = #tpu.dot_dimension_numbers<[1], [0], [0], [1], [0, 0, 1, 1], [], []>} : vector<8x32xbf16>, vector<32x256xbf16>, vector<8x256xf32> -> vector<8x256xf32>
    %159 = vector.extract_strided_slice %158 {offsets = [0, 0], sizes = [8, 128], strides = [1, 1]} : vector<8x256xf32> to vector<8x128xf32>
    %160 = vector.extract_strided_slice %158 {offsets = [0, 128], sizes = [8, 128], strides = [1, 1]} : vector<8x256xf32> to vector<8x128xf32>
    %161 = arith.select %2, %159, %160 : vector<8x128xi1>, vector<8x128xf32>
    %162 = arith.addf %161, %30 : vector<8x128xf32>
    %163 = vector.extract_strided_slice %162 {offsets = [0, 0], sizes = [8, 96], strides = [1, 1]} : vector<8x128xf32> to vector<8x96xf32>
    %164 = arith.negf %163 : vector<8x96xf32>
    %165 = math.exp %164 : vector<8x96xf32>
    %cst_19 = arith.constant 1.000000e+00 : f32
    %166 = vector.broadcast %cst_19 : f32 to vector<8x96xf32>
    %167 = arith.addf %166, %165 : vector<8x96xf32>
    %168 = arith.divf %166, %167 : vector<8x96xf32>
    %169 = vector.extract_strided_slice %162 {offsets = [0, 96], sizes = [8, 32], strides = [1, 1]} : vector<8x128xf32> to vector<8x32xf32>
    %170 = math.tanh %169 : vector<8x32xf32>
    %171 = vector.extract_strided_slice %168 {offsets = [0, 32], sizes = [8, 32], strides = [1, 1]} : vector<8x96xf32> to vector<8x32xf32>
    %172 = arith.mulf %171, %153 : vector<8x32xf32>
    %173 = vector.extract_strided_slice %168 {offsets = [0, 0], sizes = [8, 32], strides = [1, 1]} : vector<8x96xf32> to vector<8x32xf32>
    %174 = arith.mulf %173, %170 : vector<8x32xf32>
    %175 = arith.addf %172, %174 : vector<8x32xf32>
    %176 = vector.extract_strided_slice %168 {offsets = [0, 64], sizes = [8, 32], strides = [1, 1]} : vector<8x96xf32> to vector<8x32xf32>
    %177 = math.tanh %175 : vector<8x32xf32>
    %178 = arith.mulf %176, %177 : vector<8x32xf32>
    %179 = arith.truncf %178 : vector<8x32xf32> to vector<8x32xbf16>
    %cst_20 = arith.constant dense<0.000000e+00> : vector<8x256xf32>
    %180 = tpu.matmul %179, %9, %cst_20 {dimension_numbers = #tpu.dot_dimension_numbers<[1], [0], [0], [1], [0, 0, 1, 1], [], []>} : vector<8x32xbf16>, vector<32x256xbf16>, vector<8x256xf32> -> vector<8x256xf32>
    %181 = vector.extract_strided_slice %180 {offsets = [0, 0], sizes = [8, 128], strides = [1, 1]} : vector<8x256xf32> to vector<8x128xf32>
    %182 = vector.extract_strided_slice %180 {offsets = [0, 128], sizes = [8, 128], strides = [1, 1]} : vector<8x256xf32> to vector<8x128xf32>
    %183 = arith.select %2, %181, %182 : vector<8x128xi1>, vector<8x128xf32>
    %184 = arith.addf %183, %33 : vector<8x128xf32>
    %185 = vector.extract_strided_slice %184 {offsets = [0, 0], sizes = [8, 96], strides = [1, 1]} : vector<8x128xf32> to vector<8x96xf32>
    %186 = arith.negf %185 : vector<8x96xf32>
    %187 = math.exp %186 : vector<8x96xf32>
    %cst_21 = arith.constant 1.000000e+00 : f32
    %188 = vector.broadcast %cst_21 : f32 to vector<8x96xf32>
    %189 = arith.addf %188, %187 : vector<8x96xf32>
    %190 = arith.divf %188, %189 : vector<8x96xf32>
    %191 = vector.extract_strided_slice %184 {offsets = [0, 96], sizes = [8, 32], strides = [1, 1]} : vector<8x128xf32> to vector<8x32xf32>
    %192 = math.tanh %191 : vector<8x32xf32>
    %193 = vector.extract_strided_slice %190 {offsets = [0, 32], sizes = [8, 32], strides = [1, 1]} : vector<8x96xf32> to vector<8x32xf32>
    %194 = arith.mulf %193, %175 : vector<8x32xf32>
    %195 = vector.extract_strided_slice %190 {offsets = [0, 0], sizes = [8, 32], strides = [1, 1]} : vector<8x96xf32> to vector<8x32xf32>
    %196 = arith.mulf %195, %192 : vector<8x32xf32>
    %197 = arith.addf %194, %196 : vector<8x32xf32>
    %198 = vector.extract_strided_slice %190 {offsets = [0, 64], sizes = [8, 32], strides = [1, 1]} : vector<8x96xf32> to vector<8x32xf32>
    %199 = math.tanh %197 : vector<8x32xf32>
    %200 = arith.mulf %198, %199 : vector<8x32xf32>
    %201 = vector.extract_strided_slice %46 {offsets = [0, 0], sizes = [4, 32], strides = [1, 1]} : vector<8x32xf32> to vector<4x32xf32>
    %202 = vector.extract_strided_slice %68 {offsets = [0, 0], sizes = [4, 32], strides = [1, 1]} : vector<8x32xf32> to vector<4x32xf32>
    %203 = vector.extract_strided_slice %90 {offsets = [0, 0], sizes = [4, 32], strides = [1, 1]} : vector<8x32xf32> to vector<4x32xf32>
    %204 = vector.extract_strided_slice %112 {offsets = [0, 0], sizes = [4, 32], strides = [1, 1]} : vector<8x32xf32> to vector<4x32xf32>
    %205 = vector.extract_strided_slice %134 {offsets = [0, 0], sizes = [4, 32], strides = [1, 1]} : vector<8x32xf32> to vector<4x32xf32>
    %206 = vector.extract_strided_slice %156 {offsets = [0, 0], sizes = [4, 32], strides = [1, 1]} : vector<8x32xf32> to vector<4x32xf32>
    %207 = vector.extract_strided_slice %178 {offsets = [0, 0], sizes = [4, 32], strides = [1, 1]} : vector<8x32xf32> to vector<4x32xf32>
    %208 = vector.extract_strided_slice %200 {offsets = [0, 0], sizes = [4, 32], strides = [1, 1]} : vector<8x32xf32> to vector<4x32xf32>
    %209 = tpu.concatenate %201, %202, %203, %204, %205, %206, %207, %208 in 0 : vector<4x32xf32>, vector<4x32xf32>, vector<4x32xf32>, vector<4x32xf32>, vector<4x32xf32>, vector<4x32xf32>, vector<4x32xf32>, vector<4x32xf32> -> vector<32x32xf32>
    %210 = vector.extract_strided_slice %200 {offsets = [4, 0], sizes = [4, 32], strides = [1, 1]} : vector<8x32xf32> to vector<4x32xf32>
    %211 = vector.extract_strided_slice %178 {offsets = [4, 0], sizes = [4, 32], strides = [1, 1]} : vector<8x32xf32> to vector<4x32xf32>
    %212 = vector.extract_strided_slice %156 {offsets = [4, 0], sizes = [4, 32], strides = [1, 1]} : vector<8x32xf32> to vector<4x32xf32>
    %213 = vector.extract_strided_slice %134 {offsets = [4, 0], sizes = [4, 32], strides = [1, 1]} : vector<8x32xf32> to vector<4x32xf32>
    %214 = vector.extract_strided_slice %112 {offsets = [4, 0], sizes = [4, 32], strides = [1, 1]} : vector<8x32xf32> to vector<4x32xf32>
    %215 = vector.extract_strided_slice %90 {offsets = [4, 0], sizes = [4, 32], strides = [1, 1]} : vector<8x32xf32> to vector<4x32xf32>
    %216 = vector.extract_strided_slice %68 {offsets = [4, 0], sizes = [4, 32], strides = [1, 1]} : vector<8x32xf32> to vector<4x32xf32>
    %217 = vector.extract_strided_slice %46 {offsets = [4, 0], sizes = [4, 32], strides = [1, 1]} : vector<8x32xf32> to vector<4x32xf32>
    %218 = tpu.concatenate %210, %211, %212, %213, %214, %215, %216, %217 in 0 : vector<4x32xf32>, vector<4x32xf32>, vector<4x32xf32>, vector<4x32xf32>, vector<4x32xf32>, vector<4x32xf32>, vector<4x32xf32>, vector<4x32xf32> -> vector<32x32xf32>
    %c0_22 = arith.constant 0 : index
    %c0_23 = arith.constant 0 : index
    %219 = vector.load %arg7[%c0_22, %c0_23] : memref<1x64xf32, #tpu.memory_space<vmem>>, vector<1x64xf32>
    %220 = vector.extract_strided_slice %219 {offsets = [0, 0], sizes = [1, 32], strides = [1, 1]} : vector<1x64xf32> to vector<1x32xf32>
    %cst_24 = arith.constant dense<0.000000e+00> : vector<1x32xf32>
    %221 = tpu.matmul %220, %209, %cst_24 {dimension_numbers = #tpu.dot_dimension_numbers<[1], [1], [0], [0], [0, 0, 1, 0], [], []>} : vector<1x32xf32>, vector<32x32xf32>, vector<1x32xf32> -> vector<1x32xf32>
    %222 = vector.extract_strided_slice %219 {offsets = [0, 32], sizes = [1, 32], strides = [1, 1]} : vector<1x64xf32> to vector<1x32xf32>
    %cst_25 = arith.constant dense<0.000000e+00> : vector<1x32xf32>
    %223 = tpu.matmul %222, %218, %cst_25 {dimension_numbers = #tpu.dot_dimension_numbers<[1], [1], [0], [0], [0, 0, 1, 0], [], []>} : vector<1x32xf32>, vector<32x32xf32>, vector<1x32xf32> -> vector<1x32xf32>
    %224 = arith.addf %221, %223 : vector<1x32xf32>
    %cst_26 = arith.constant 0.000000e+00 : f32
    %225 = vector.broadcast %cst_26 : f32 to vector<1x32xf32>
    %226 = arith.maximumf %224, %225 : vector<1x32xf32>
    %227 = vector.shape_cast %226 : vector<1x32xf32> to vector<1x32xf32>
    %228 = vector.broadcast %227 : vector<1x32xf32> to vector<8x32xf32>
    %c0_27 = arith.constant 0 : index
    %c0_28 = arith.constant 0 : index
    %229 = vector.load %arg9[%c0_27, %c0_28] : memref<8x32xf32, #tpu.memory_space<vmem>>, vector<8x32xf32>
    %230 = arith.addf %228, %229 : vector<8x32xf32>
    %cst_29 = arith.constant dense<0xFF800000> : vector<8xf32>
    %231 = vector.multi_reduction <maximumf>, %230, %cst_29 [1] : vector<8x32xf32> to vector<8xf32>
    %232 = vector.shape_cast %231 : vector<8xf32> to vector<8x1xf32>
    %233 = vector.broadcast %232 : vector<8x1xf32> to vector<8x32xf32>
    %234 = arith.subf %230, %233 : vector<8x32xf32>
    %235 = math.exp %234 : vector<8x32xf32>
    %cst_30 = arith.constant dense<0.000000e+00> : vector<8xf32>
    %236 = vector.multi_reduction <add>, %235, %cst_30 [1] : vector<8x32xf32> to vector<8xf32>
    %237 = vector.shape_cast %236 : vector<8xf32> to vector<8x1xf32>
    %238 = vector.broadcast %237 : vector<8x1xf32> to vector<8x32xf32>
    %239 = arith.divf %235, %238 : vector<8x32xf32>
    %cst_31 = arith.constant dense<0.000000e+00> : vector<8x32xf32>
    %240 = tpu.matmul %239, %209, %cst_31 {dimension_numbers = #tpu.dot_dimension_numbers<[1], [0], [0], [1], [0, 0, 1, 1], [], []>} : vector<8x32xf32>, vector<32x32xf32>, vector<8x32xf32> -> vector<8x32xf32>
    %cst_32 = arith.constant dense<0.000000e+00> : vector<8x32xf32>
    %241 = tpu.matmul %239, %218, %cst_32 {dimension_numbers = #tpu.dot_dimension_numbers<[1], [0], [0], [1], [0, 0, 1, 1], [], []>} : vector<8x32xf32>, vector<32x32xf32>, vector<8x32xf32> -> vector<8x32xf32>
    %c0_33 = arith.constant 0 : index
    %c0_34 = arith.constant 0 : index
    %242 = vector.load %arg4[%c0_33, %c0_34] : memref<64x256xbf16, #tpu.memory_space<vmem>>, vector<64x256xbf16>
    %243 = arith.truncf %209 : vector<32x32xf32> to vector<32x32xbf16>
    %244 = vector.extract_strided_slice %242 {offsets = [0, 0], sizes = [32, 256], strides = [1, 1]} : vector<64x256xbf16> to vector<32x256xbf16>
    %cst_35 = arith.constant dense<0.000000e+00> : vector<32x256xf32>
    %245 = tpu.matmul %243, %244, %cst_35 {dimension_numbers = #tpu.dot_dimension_numbers<[1], [0], [0], [1], [0, 0, 1, 1], [], []>} : vector<32x32xbf16>, vector<32x256xbf16>, vector<32x256xf32> -> vector<32x256xf32>
    %246 = arith.truncf %218 : vector<32x32xf32> to vector<32x32xbf16>
    %247 = vector.extract_strided_slice %242 {offsets = [32, 0], sizes = [32, 256], strides = [1, 1]} : vector<64x256xbf16> to vector<32x256xbf16>
    %cst_36 = arith.constant dense<0.000000e+00> : vector<32x256xf32>
    %248 = tpu.matmul %246, %247, %cst_36 {dimension_numbers = #tpu.dot_dimension_numbers<[1], [0], [0], [1], [0, 0, 1, 1], [], []>} : vector<32x32xbf16>, vector<32x256xbf16>, vector<32x256xf32> -> vector<32x256xf32>
    %249 = arith.addf %245, %248 : vector<32x256xf32>
    %c0_37 = arith.constant 0 : index
    %c0_38 = arith.constant 0 : index
    %250 = vector.load %arg6[%c0_37, %c0_38] : memref<1x256xf32, #tpu.memory_space<vmem>>, vector<1x256xf32>
    %251 = vector.broadcast %250 : vector<1x256xf32> to vector<32x256xf32>
    %252 = arith.addf %249, %251 : vector<32x256xf32>
    %c0_39 = arith.constant 0 : index
    %c0_40 = arith.constant 0 : index
    %253 = vector.load %arg5[%c0_39, %c0_40] : memref<32x256xbf16, #tpu.memory_space<vmem>>, vector<32x256xbf16>
    %254 = vector.extract_strided_slice %252 {offsets = [0, 0], sizes = [4, 128], strides = [1, 1]} : vector<32x256xf32> to vector<4x128xf32>
    %255 = vector.extract_strided_slice %252 {offsets = [28, 128], sizes = [4, 128], strides = [1, 1]} : vector<32x256xf32> to vector<4x128xf32>
    %256 = tpu.concatenate %254, %255 in 0 : vector<4x128xf32>, vector<4x128xf32> -> vector<8x128xf32>
    %257 = vector.extract_strided_slice %252 {offsets = [4, 0], sizes = [4, 128], strides = [1, 1]} : vector<32x256xf32> to vector<4x128xf32>
    %258 = vector.extract_strided_slice %252 {offsets = [24, 128], sizes = [4, 128], strides = [1, 1]} : vector<32x256xf32> to vector<4x128xf32>
    %259 = tpu.concatenate %257, %258 in 0 : vector<4x128xf32>, vector<4x128xf32> -> vector<8x128xf32>
    %260 = vector.extract_strided_slice %252 {offsets = [8, 0], sizes = [4, 128], strides = [1, 1]} : vector<32x256xf32> to vector<4x128xf32>
    %261 = vector.extract_strided_slice %252 {offsets = [20, 128], sizes = [4, 128], strides = [1, 1]} : vector<32x256xf32> to vector<4x128xf32>
    %262 = tpu.concatenate %260, %261 in 0 : vector<4x128xf32>, vector<4x128xf32> -> vector<8x128xf32>
    %263 = vector.extract_strided_slice %252 {offsets = [12, 0], sizes = [4, 128], strides = [1, 1]} : vector<32x256xf32> to vector<4x128xf32>
    %264 = vector.extract_strided_slice %252 {offsets = [16, 128], sizes = [4, 128], strides = [1, 1]} : vector<32x256xf32> to vector<4x128xf32>
    %265 = tpu.concatenate %263, %264 in 0 : vector<4x128xf32>, vector<4x128xf32> -> vector<8x128xf32>
    %266 = vector.extract_strided_slice %252 {offsets = [16, 0], sizes = [4, 128], strides = [1, 1]} : vector<32x256xf32> to vector<4x128xf32>
    %267 = vector.extract_strided_slice %252 {offsets = [12, 128], sizes = [4, 128], strides = [1, 1]} : vector<32x256xf32> to vector<4x128xf32>
    %268 = tpu.concatenate %266, %267 in 0 : vector<4x128xf32>, vector<4x128xf32> -> vector<8x128xf32>
    %269 = vector.extract_strided_slice %252 {offsets = [20, 0], sizes = [4, 128], strides = [1, 1]} : vector<32x256xf32> to vector<4x128xf32>
    %270 = vector.extract_strided_slice %252 {offsets = [8, 128], sizes = [4, 128], strides = [1, 1]} : vector<32x256xf32> to vector<4x128xf32>
    %271 = tpu.concatenate %269, %270 in 0 : vector<4x128xf32>, vector<4x128xf32> -> vector<8x128xf32>
    %272 = vector.extract_strided_slice %252 {offsets = [24, 0], sizes = [4, 128], strides = [1, 1]} : vector<32x256xf32> to vector<4x128xf32>
    %273 = vector.extract_strided_slice %252 {offsets = [4, 128], sizes = [4, 128], strides = [1, 1]} : vector<32x256xf32> to vector<4x128xf32>
    %274 = tpu.concatenate %272, %273 in 0 : vector<4x128xf32>, vector<4x128xf32> -> vector<8x128xf32>
    %275 = vector.extract_strided_slice %252 {offsets = [28, 0], sizes = [4, 128], strides = [1, 1]} : vector<32x256xf32> to vector<4x128xf32>
    %276 = vector.extract_strided_slice %252 {offsets = [0, 128], sizes = [4, 128], strides = [1, 1]} : vector<32x256xf32> to vector<4x128xf32>
    %277 = tpu.concatenate %275, %276 in 0 : vector<4x128xf32>, vector<4x128xf32> -> vector<8x128xf32>
    %278 = vector.extract_strided_slice %256 {offsets = [0, 0], sizes = [8, 96], strides = [1, 1]} : vector<8x128xf32> to vector<8x96xf32>
    %279 = arith.negf %278 : vector<8x96xf32>
    %280 = math.exp %279 : vector<8x96xf32>
    %cst_41 = arith.constant 1.000000e+00 : f32
    %281 = vector.broadcast %cst_41 : f32 to vector<8x96xf32>
    %282 = arith.addf %281, %280 : vector<8x96xf32>
    %283 = arith.divf %281, %282 : vector<8x96xf32>
    %284 = vector.extract_strided_slice %256 {offsets = [0, 96], sizes = [8, 32], strides = [1, 1]} : vector<8x128xf32> to vector<8x32xf32>
    %285 = math.tanh %284 : vector<8x32xf32>
    %286 = vector.extract_strided_slice %283 {offsets = [0, 0], sizes = [8, 32], strides = [1, 1]} : vector<8x96xf32> to vector<8x32xf32>
    %287 = arith.mulf %286, %285 : vector<8x32xf32>
    %288 = vector.extract_strided_slice %283 {offsets = [0, 64], sizes = [8, 32], strides = [1, 1]} : vector<8x96xf32> to vector<8x32xf32>
    %289 = math.tanh %287 : vector<8x32xf32>
    %290 = arith.mulf %288, %289 : vector<8x32xf32>
    %291 = arith.truncf %290 : vector<8x32xf32> to vector<8x32xbf16>
    %cst_42 = arith.constant dense<0.000000e+00> : vector<8x256xf32>
    %292 = tpu.matmul %291, %253, %cst_42 {dimension_numbers = #tpu.dot_dimension_numbers<[1], [0], [0], [1], [0, 0, 1, 1], [], []>} : vector<8x32xbf16>, vector<32x256xbf16>, vector<8x256xf32> -> vector<8x256xf32>
    %293 = vector.extract_strided_slice %292 {offsets = [0, 0], sizes = [8, 128], strides = [1, 1]} : vector<8x256xf32> to vector<8x128xf32>
    %294 = vector.extract_strided_slice %292 {offsets = [0, 128], sizes = [8, 128], strides = [1, 1]} : vector<8x256xf32> to vector<8x128xf32>
    %295 = arith.select %2, %293, %294 : vector<8x128xi1>, vector<8x128xf32>
    %296 = arith.addf %295, %259 : vector<8x128xf32>
    %297 = vector.extract_strided_slice %296 {offsets = [0, 0], sizes = [8, 96], strides = [1, 1]} : vector<8x128xf32> to vector<8x96xf32>
    %298 = arith.negf %297 : vector<8x96xf32>
    %299 = math.exp %298 : vector<8x96xf32>
    %cst_43 = arith.constant 1.000000e+00 : f32
    %300 = vector.broadcast %cst_43 : f32 to vector<8x96xf32>
    %301 = arith.addf %300, %299 : vector<8x96xf32>
    %302 = arith.divf %300, %301 : vector<8x96xf32>
    %303 = vector.extract_strided_slice %296 {offsets = [0, 96], sizes = [8, 32], strides = [1, 1]} : vector<8x128xf32> to vector<8x32xf32>
    %304 = math.tanh %303 : vector<8x32xf32>
    %305 = vector.extract_strided_slice %302 {offsets = [0, 32], sizes = [8, 32], strides = [1, 1]} : vector<8x96xf32> to vector<8x32xf32>
    %306 = arith.mulf %305, %287 : vector<8x32xf32>
    %307 = vector.extract_strided_slice %302 {offsets = [0, 0], sizes = [8, 32], strides = [1, 1]} : vector<8x96xf32> to vector<8x32xf32>
    %308 = arith.mulf %307, %304 : vector<8x32xf32>
    %309 = arith.addf %306, %308 : vector<8x32xf32>
    %310 = vector.extract_strided_slice %302 {offsets = [0, 64], sizes = [8, 32], strides = [1, 1]} : vector<8x96xf32> to vector<8x32xf32>
    %311 = math.tanh %309 : vector<8x32xf32>
    %312 = arith.mulf %310, %311 : vector<8x32xf32>
    %313 = arith.truncf %312 : vector<8x32xf32> to vector<8x32xbf16>
    %cst_44 = arith.constant dense<0.000000e+00> : vector<8x256xf32>
    %314 = tpu.matmul %313, %253, %cst_44 {dimension_numbers = #tpu.dot_dimension_numbers<[1], [0], [0], [1], [0, 0, 1, 1], [], []>} : vector<8x32xbf16>, vector<32x256xbf16>, vector<8x256xf32> -> vector<8x256xf32>
    %315 = vector.extract_strided_slice %314 {offsets = [0, 0], sizes = [8, 128], strides = [1, 1]} : vector<8x256xf32> to vector<8x128xf32>
    %316 = vector.extract_strided_slice %314 {offsets = [0, 128], sizes = [8, 128], strides = [1, 1]} : vector<8x256xf32> to vector<8x128xf32>
    %317 = arith.select %2, %315, %316 : vector<8x128xi1>, vector<8x128xf32>
    %318 = arith.addf %317, %262 : vector<8x128xf32>
    %319 = vector.extract_strided_slice %318 {offsets = [0, 0], sizes = [8, 96], strides = [1, 1]} : vector<8x128xf32> to vector<8x96xf32>
    %320 = arith.negf %319 : vector<8x96xf32>
    %321 = math.exp %320 : vector<8x96xf32>
    %cst_45 = arith.constant 1.000000e+00 : f32
    %322 = vector.broadcast %cst_45 : f32 to vector<8x96xf32>
    %323 = arith.addf %322, %321 : vector<8x96xf32>
    %324 = arith.divf %322, %323 : vector<8x96xf32>
    %325 = vector.extract_strided_slice %318 {offsets = [0, 96], sizes = [8, 32], strides = [1, 1]} : vector<8x128xf32> to vector<8x32xf32>
    %326 = math.tanh %325 : vector<8x32xf32>
    %327 = vector.extract_strided_slice %324 {offsets = [0, 32], sizes = [8, 32], strides = [1, 1]} : vector<8x96xf32> to vector<8x32xf32>
    %328 = arith.mulf %327, %309 : vector<8x32xf32>
    %329 = vector.extract_strided_slice %324 {offsets = [0, 0], sizes = [8, 32], strides = [1, 1]} : vector<8x96xf32> to vector<8x32xf32>
    %330 = arith.mulf %329, %326 : vector<8x32xf32>
    %331 = arith.addf %328, %330 : vector<8x32xf32>
    %332 = vector.extract_strided_slice %324 {offsets = [0, 64], sizes = [8, 32], strides = [1, 1]} : vector<8x96xf32> to vector<8x32xf32>
    %333 = math.tanh %331 : vector<8x32xf32>
    %334 = arith.mulf %332, %333 : vector<8x32xf32>
    %335 = arith.truncf %334 : vector<8x32xf32> to vector<8x32xbf16>
    %cst_46 = arith.constant dense<0.000000e+00> : vector<8x256xf32>
    %336 = tpu.matmul %335, %253, %cst_46 {dimension_numbers = #tpu.dot_dimension_numbers<[1], [0], [0], [1], [0, 0, 1, 1], [], []>} : vector<8x32xbf16>, vector<32x256xbf16>, vector<8x256xf32> -> vector<8x256xf32>
    %337 = vector.extract_strided_slice %336 {offsets = [0, 0], sizes = [8, 128], strides = [1, 1]} : vector<8x256xf32> to vector<8x128xf32>
    %338 = vector.extract_strided_slice %336 {offsets = [0, 128], sizes = [8, 128], strides = [1, 1]} : vector<8x256xf32> to vector<8x128xf32>
    %339 = arith.select %2, %337, %338 : vector<8x128xi1>, vector<8x128xf32>
    %340 = arith.addf %339, %265 : vector<8x128xf32>
    %341 = vector.extract_strided_slice %340 {offsets = [0, 0], sizes = [8, 96], strides = [1, 1]} : vector<8x128xf32> to vector<8x96xf32>
    %342 = arith.negf %341 : vector<8x96xf32>
    %343 = math.exp %342 : vector<8x96xf32>
    %cst_47 = arith.constant 1.000000e+00 : f32
    %344 = vector.broadcast %cst_47 : f32 to vector<8x96xf32>
    %345 = arith.addf %344, %343 : vector<8x96xf32>
    %346 = arith.divf %344, %345 : vector<8x96xf32>
    %347 = vector.extract_strided_slice %340 {offsets = [0, 96], sizes = [8, 32], strides = [1, 1]} : vector<8x128xf32> to vector<8x32xf32>
    %348 = math.tanh %347 : vector<8x32xf32>
    %349 = vector.extract_strided_slice %346 {offsets = [0, 32], sizes = [8, 32], strides = [1, 1]} : vector<8x96xf32> to vector<8x32xf32>
    %350 = arith.mulf %349, %331 : vector<8x32xf32>
    %351 = vector.extract_strided_slice %346 {offsets = [0, 0], sizes = [8, 32], strides = [1, 1]} : vector<8x96xf32> to vector<8x32xf32>
    %352 = arith.mulf %351, %348 : vector<8x32xf32>
    %353 = arith.addf %350, %352 : vector<8x32xf32>
    %354 = vector.extract_strided_slice %346 {offsets = [0, 64], sizes = [8, 32], strides = [1, 1]} : vector<8x96xf32> to vector<8x32xf32>
    %355 = math.tanh %353 : vector<8x32xf32>
    %356 = arith.mulf %354, %355 : vector<8x32xf32>
    %357 = arith.truncf %356 : vector<8x32xf32> to vector<8x32xbf16>
    %cst_48 = arith.constant dense<0.000000e+00> : vector<8x256xf32>
    %358 = tpu.matmul %357, %253, %cst_48 {dimension_numbers = #tpu.dot_dimension_numbers<[1], [0], [0], [1], [0, 0, 1, 1], [], []>} : vector<8x32xbf16>, vector<32x256xbf16>, vector<8x256xf32> -> vector<8x256xf32>
    %359 = vector.extract_strided_slice %358 {offsets = [0, 0], sizes = [8, 128], strides = [1, 1]} : vector<8x256xf32> to vector<8x128xf32>
    %360 = vector.extract_strided_slice %358 {offsets = [0, 128], sizes = [8, 128], strides = [1, 1]} : vector<8x256xf32> to vector<8x128xf32>
    %361 = arith.select %2, %359, %360 : vector<8x128xi1>, vector<8x128xf32>
    %362 = arith.addf %361, %268 : vector<8x128xf32>
    %363 = vector.extract_strided_slice %362 {offsets = [0, 0], sizes = [8, 96], strides = [1, 1]} : vector<8x128xf32> to vector<8x96xf32>
    %364 = arith.negf %363 : vector<8x96xf32>
    %365 = math.exp %364 : vector<8x96xf32>
    %cst_49 = arith.constant 1.000000e+00 : f32
    %366 = vector.broadcast %cst_49 : f32 to vector<8x96xf32>
    %367 = arith.addf %366, %365 : vector<8x96xf32>
    %368 = arith.divf %366, %367 : vector<8x96xf32>
    %369 = vector.extract_strided_slice %362 {offsets = [0, 96], sizes = [8, 32], strides = [1, 1]} : vector<8x128xf32> to vector<8x32xf32>
    %370 = math.tanh %369 : vector<8x32xf32>
    %371 = vector.extract_strided_slice %368 {offsets = [0, 32], sizes = [8, 32], strides = [1, 1]} : vector<8x96xf32> to vector<8x32xf32>
    %372 = arith.mulf %371, %353 : vector<8x32xf32>
    %373 = vector.extract_strided_slice %368 {offsets = [0, 0], sizes = [8, 32], strides = [1, 1]} : vector<8x96xf32> to vector<8x32xf32>
    %374 = arith.mulf %373, %370 : vector<8x32xf32>
    %375 = arith.addf %372, %374 : vector<8x32xf32>
    %376 = vector.extract_strided_slice %368 {offsets = [0, 64], sizes = [8, 32], strides = [1, 1]} : vector<8x96xf32> to vector<8x32xf32>
    %377 = math.tanh %375 : vector<8x32xf32>
    %378 = arith.mulf %376, %377 : vector<8x32xf32>
    %379 = arith.truncf %378 : vector<8x32xf32> to vector<8x32xbf16>
    %cst_50 = arith.constant dense<0.000000e+00> : vector<8x256xf32>
    %380 = tpu.matmul %379, %253, %cst_50 {dimension_numbers = #tpu.dot_dimension_numbers<[1], [0], [0], [1], [0, 0, 1, 1], [], []>} : vector<8x32xbf16>, vector<32x256xbf16>, vector<8x256xf32> -> vector<8x256xf32>
    %381 = vector.extract_strided_slice %380 {offsets = [0, 0], sizes = [8, 128], strides = [1, 1]} : vector<8x256xf32> to vector<8x128xf32>
    %382 = vector.extract_strided_slice %380 {offsets = [0, 128], sizes = [8, 128], strides = [1, 1]} : vector<8x256xf32> to vector<8x128xf32>
    %383 = arith.select %2, %381, %382 : vector<8x128xi1>, vector<8x128xf32>
    %384 = arith.addf %383, %271 : vector<8x128xf32>
    %385 = vector.extract_strided_slice %384 {offsets = [0, 0], sizes = [8, 96], strides = [1, 1]} : vector<8x128xf32> to vector<8x96xf32>
    %386 = arith.negf %385 : vector<8x96xf32>
    %387 = math.exp %386 : vector<8x96xf32>
    %cst_51 = arith.constant 1.000000e+00 : f32
    %388 = vector.broadcast %cst_51 : f32 to vector<8x96xf32>
    %389 = arith.addf %388, %387 : vector<8x96xf32>
    %390 = arith.divf %388, %389 : vector<8x96xf32>
    %391 = vector.extract_strided_slice %384 {offsets = [0, 96], sizes = [8, 32], strides = [1, 1]} : vector<8x128xf32> to vector<8x32xf32>
    %392 = math.tanh %391 : vector<8x32xf32>
    %393 = vector.extract_strided_slice %390 {offsets = [0, 32], sizes = [8, 32], strides = [1, 1]} : vector<8x96xf32> to vector<8x32xf32>
    %394 = arith.mulf %393, %375 : vector<8x32xf32>
    %395 = vector.extract_strided_slice %390 {offsets = [0, 0], sizes = [8, 32], strides = [1, 1]} : vector<8x96xf32> to vector<8x32xf32>
    %396 = arith.mulf %395, %392 : vector<8x32xf32>
    %397 = arith.addf %394, %396 : vector<8x32xf32>
    %398 = vector.extract_strided_slice %390 {offsets = [0, 64], sizes = [8, 32], strides = [1, 1]} : vector<8x96xf32> to vector<8x32xf32>
    %399 = math.tanh %397 : vector<8x32xf32>
    %400 = arith.mulf %398, %399 : vector<8x32xf32>
    %401 = arith.truncf %400 : vector<8x32xf32> to vector<8x32xbf16>
    %cst_52 = arith.constant dense<0.000000e+00> : vector<8x256xf32>
    %402 = tpu.matmul %401, %253, %cst_52 {dimension_numbers = #tpu.dot_dimension_numbers<[1], [0], [0], [1], [0, 0, 1, 1], [], []>} : vector<8x32xbf16>, vector<32x256xbf16>, vector<8x256xf32> -> vector<8x256xf32>
    %403 = vector.extract_strided_slice %402 {offsets = [0, 0], sizes = [8, 128], strides = [1, 1]} : vector<8x256xf32> to vector<8x128xf32>
    %404 = vector.extract_strided_slice %402 {offsets = [0, 128], sizes = [8, 128], strides = [1, 1]} : vector<8x256xf32> to vector<8x128xf32>
    %405 = arith.select %2, %403, %404 : vector<8x128xi1>, vector<8x128xf32>
    %406 = arith.addf %405, %274 : vector<8x128xf32>
    %407 = vector.extract_strided_slice %406 {offsets = [0, 0], sizes = [8, 96], strides = [1, 1]} : vector<8x128xf32> to vector<8x96xf32>
    %408 = arith.negf %407 : vector<8x96xf32>
    %409 = math.exp %408 : vector<8x96xf32>
    %cst_53 = arith.constant 1.000000e+00 : f32
    %410 = vector.broadcast %cst_53 : f32 to vector<8x96xf32>
    %411 = arith.addf %410, %409 : vector<8x96xf32>
    %412 = arith.divf %410, %411 : vector<8x96xf32>
    %413 = vector.extract_strided_slice %406 {offsets = [0, 96], sizes = [8, 32], strides = [1, 1]} : vector<8x128xf32> to vector<8x32xf32>
    %414 = math.tanh %413 : vector<8x32xf32>
    %415 = vector.extract_strided_slice %412 {offsets = [0, 32], sizes = [8, 32], strides = [1, 1]} : vector<8x96xf32> to vector<8x32xf32>
    %416 = arith.mulf %415, %397 : vector<8x32xf32>
    %417 = vector.extract_strided_slice %412 {offsets = [0, 0], sizes = [8, 32], strides = [1, 1]} : vector<8x96xf32> to vector<8x32xf32>
    %418 = arith.mulf %417, %414 : vector<8x32xf32>
    %419 = arith.addf %416, %418 : vector<8x32xf32>
    %420 = vector.extract_strided_slice %412 {offsets = [0, 64], sizes = [8, 32], strides = [1, 1]} : vector<8x96xf32> to vector<8x32xf32>
    %421 = math.tanh %419 : vector<8x32xf32>
    %422 = arith.mulf %420, %421 : vector<8x32xf32>
    %423 = arith.truncf %422 : vector<8x32xf32> to vector<8x32xbf16>
    %cst_54 = arith.constant dense<0.000000e+00> : vector<8x256xf32>
    %424 = tpu.matmul %423, %253, %cst_54 {dimension_numbers = #tpu.dot_dimension_numbers<[1], [0], [0], [1], [0, 0, 1, 1], [], []>} : vector<8x32xbf16>, vector<32x256xbf16>, vector<8x256xf32> -> vector<8x256xf32>
    %425 = vector.extract_strided_slice %424 {offsets = [0, 0], sizes = [8, 128], strides = [1, 1]} : vector<8x256xf32> to vector<8x128xf32>
    %426 = vector.extract_strided_slice %424 {offsets = [0, 128], sizes = [8, 128], strides = [1, 1]} : vector<8x256xf32> to vector<8x128xf32>
    %427 = arith.select %2, %425, %426 : vector<8x128xi1>, vector<8x128xf32>
    %428 = arith.addf %427, %277 : vector<8x128xf32>
    %429 = vector.extract_strided_slice %428 {offsets = [0, 0], sizes = [8, 96], strides = [1, 1]} : vector<8x128xf32> to vector<8x96xf32>
    %430 = arith.negf %429 : vector<8x96xf32>
    %431 = math.exp %430 : vector<8x96xf32>
    %cst_55 = arith.constant 1.000000e+00 : f32
    %432 = vector.broadcast %cst_55 : f32 to vector<8x96xf32>
    %433 = arith.addf %432, %431 : vector<8x96xf32>
    %434 = arith.divf %432, %433 : vector<8x96xf32>
    %435 = vector.extract_strided_slice %428 {offsets = [0, 96], sizes = [8, 32], strides = [1, 1]} : vector<8x128xf32> to vector<8x32xf32>
    %436 = math.tanh %435 : vector<8x32xf32>
    %437 = vector.extract_strided_slice %434 {offsets = [0, 32], sizes = [8, 32], strides = [1, 1]} : vector<8x96xf32> to vector<8x32xf32>
    %438 = arith.mulf %437, %419 : vector<8x32xf32>
    %439 = vector.extract_strided_slice %434 {offsets = [0, 0], sizes = [8, 32], strides = [1, 1]} : vector<8x96xf32> to vector<8x32xf32>
    %440 = arith.mulf %439, %436 : vector<8x32xf32>
    %441 = arith.addf %438, %440 : vector<8x32xf32>
    %442 = vector.extract_strided_slice %434 {offsets = [0, 64], sizes = [8, 32], strides = [1, 1]} : vector<8x96xf32> to vector<8x32xf32>
    %443 = math.tanh %441 : vector<8x32xf32>
    %444 = arith.mulf %442, %443 : vector<8x32xf32>
    %445 = vector.extract_strided_slice %290 {offsets = [0, 0], sizes = [4, 32], strides = [1, 1]} : vector<8x32xf32> to vector<4x32xf32>
    %446 = vector.extract_strided_slice %312 {offsets = [0, 0], sizes = [4, 32], strides = [1, 1]} : vector<8x32xf32> to vector<4x32xf32>
    %447 = vector.extract_strided_slice %334 {offsets = [0, 0], sizes = [4, 32], strides = [1, 1]} : vector<8x32xf32> to vector<4x32xf32>
    %448 = vector.extract_strided_slice %356 {offsets = [0, 0], sizes = [4, 32], strides = [1, 1]} : vector<8x32xf32> to vector<4x32xf32>
    %449 = vector.extract_strided_slice %378 {offsets = [0, 0], sizes = [4, 32], strides = [1, 1]} : vector<8x32xf32> to vector<4x32xf32>
    %450 = vector.extract_strided_slice %400 {offsets = [0, 0], sizes = [4, 32], strides = [1, 1]} : vector<8x32xf32> to vector<4x32xf32>
    %451 = vector.extract_strided_slice %422 {offsets = [0, 0], sizes = [4, 32], strides = [1, 1]} : vector<8x32xf32> to vector<4x32xf32>
    %452 = vector.extract_strided_slice %444 {offsets = [0, 0], sizes = [4, 32], strides = [1, 1]} : vector<8x32xf32> to vector<4x32xf32>
    %453 = tpu.concatenate %445, %446, %447, %448, %449, %450, %451, %452 in 0 : vector<4x32xf32>, vector<4x32xf32>, vector<4x32xf32>, vector<4x32xf32>, vector<4x32xf32>, vector<4x32xf32>, vector<4x32xf32>, vector<4x32xf32> -> vector<32x32xf32>
    %454 = vector.extract_strided_slice %444 {offsets = [4, 0], sizes = [4, 32], strides = [1, 1]} : vector<8x32xf32> to vector<4x32xf32>
    %455 = vector.extract_strided_slice %422 {offsets = [4, 0], sizes = [4, 32], strides = [1, 1]} : vector<8x32xf32> to vector<4x32xf32>
    %456 = vector.extract_strided_slice %400 {offsets = [4, 0], sizes = [4, 32], strides = [1, 1]} : vector<8x32xf32> to vector<4x32xf32>
    %457 = vector.extract_strided_slice %378 {offsets = [4, 0], sizes = [4, 32], strides = [1, 1]} : vector<8x32xf32> to vector<4x32xf32>
    %458 = vector.extract_strided_slice %356 {offsets = [4, 0], sizes = [4, 32], strides = [1, 1]} : vector<8x32xf32> to vector<4x32xf32>
    %459 = vector.extract_strided_slice %334 {offsets = [4, 0], sizes = [4, 32], strides = [1, 1]} : vector<8x32xf32> to vector<4x32xf32>
    %460 = vector.extract_strided_slice %312 {offsets = [4, 0], sizes = [4, 32], strides = [1, 1]} : vector<8x32xf32> to vector<4x32xf32>
    %461 = vector.extract_strided_slice %290 {offsets = [4, 0], sizes = [4, 32], strides = [1, 1]} : vector<8x32xf32> to vector<4x32xf32>
    %462 = tpu.concatenate %454, %455, %456, %457, %458, %459, %460, %461 in 0 : vector<4x32xf32>, vector<4x32xf32>, vector<4x32xf32>, vector<4x32xf32>, vector<4x32xf32>, vector<4x32xf32>, vector<4x32xf32>, vector<4x32xf32> -> vector<32x32xf32>
    %c0_56 = arith.constant 0 : index
    %c0_57 = arith.constant 0 : index
    %463 = vector.load %arg8[%c0_56, %c0_57] : memref<1x64xf32, #tpu.memory_space<vmem>>, vector<1x64xf32>
    %464 = vector.extract_strided_slice %463 {offsets = [0, 0], sizes = [1, 32], strides = [1, 1]} : vector<1x64xf32> to vector<1x32xf32>
    %cst_58 = arith.constant dense<0.000000e+00> : vector<1x32xf32>
    %465 = tpu.matmul %464, %453, %cst_58 {dimension_numbers = #tpu.dot_dimension_numbers<[1], [1], [0], [0], [0, 0, 1, 0], [], []>} : vector<1x32xf32>, vector<32x32xf32>, vector<1x32xf32> -> vector<1x32xf32>
    %466 = vector.extract_strided_slice %463 {offsets = [0, 32], sizes = [1, 32], strides = [1, 1]} : vector<1x64xf32> to vector<1x32xf32>
    %cst_59 = arith.constant dense<0.000000e+00> : vector<1x32xf32>
    %467 = tpu.matmul %466, %462, %cst_59 {dimension_numbers = #tpu.dot_dimension_numbers<[1], [1], [0], [0], [0, 0, 1, 0], [], []>} : vector<1x32xf32>, vector<32x32xf32>, vector<1x32xf32> -> vector<1x32xf32>
    %468 = arith.addf %465, %467 : vector<1x32xf32>
    %cst_60 = arith.constant 0.000000e+00 : f32
    %469 = vector.broadcast %cst_60 : f32 to vector<1x32xf32>
    %470 = arith.maximumf %468, %469 : vector<1x32xf32>
    %471 = vector.shape_cast %470 : vector<1x32xf32> to vector<1x32xf32>
    %472 = vector.broadcast %471 : vector<1x32xf32> to vector<8x32xf32>
    %c0_61 = arith.constant 0 : index
    %c0_62 = arith.constant 0 : index
    %473 = vector.load %arg9[%c0_61, %c0_62] : memref<8x32xf32, #tpu.memory_space<vmem>>, vector<8x32xf32>
    %474 = arith.addf %472, %473 : vector<8x32xf32>
    %cst_63 = arith.constant dense<0xFF800000> : vector<8xf32>
    %475 = vector.multi_reduction <maximumf>, %474, %cst_63 [1] : vector<8x32xf32> to vector<8xf32>
    %476 = vector.shape_cast %475 : vector<8xf32> to vector<8x1xf32>
    %477 = vector.broadcast %476 : vector<8x1xf32> to vector<8x32xf32>
    %478 = arith.subf %474, %477 : vector<8x32xf32>
    %479 = math.exp %478 : vector<8x32xf32>
    %cst_64 = arith.constant dense<0.000000e+00> : vector<8xf32>
    %480 = vector.multi_reduction <add>, %479, %cst_64 [1] : vector<8x32xf32> to vector<8xf32>
    %481 = vector.shape_cast %480 : vector<8xf32> to vector<8x1xf32>
    %482 = vector.broadcast %481 : vector<8x1xf32> to vector<8x32xf32>
    %483 = arith.divf %479, %482 : vector<8x32xf32>
    %cst_65 = arith.constant dense<0.000000e+00> : vector<8x32xf32>
    %484 = tpu.matmul %483, %453, %cst_65 {dimension_numbers = #tpu.dot_dimension_numbers<[1], [0], [0], [1], [0, 0, 1, 1], [], []>} : vector<8x32xf32>, vector<32x32xf32>, vector<8x32xf32> -> vector<8x32xf32>
    %cst_66 = arith.constant dense<0.000000e+00> : vector<8x32xf32>
    %485 = tpu.matmul %483, %462, %cst_66 {dimension_numbers = #tpu.dot_dimension_numbers<[1], [0], [0], [1], [0, 0, 1, 1], [], []>} : vector<8x32xf32>, vector<32x32xf32>, vector<8x32xf32> -> vector<8x32xf32>
    %c0_67 = arith.constant 0 : index
    %c0_68 = arith.constant 0 : index
    %486 = vector.load %arg10[%c0_67, %c0_68] : memref<128x128xf32, #tpu.memory_space<vmem>>, vector<128x128xf32>
    %487 = vector.extract_strided_slice %486 {offsets = [0, 0], sizes = [32, 128], strides = [1, 1]} : vector<128x128xf32> to vector<32x128xf32>
    %cst_69 = arith.constant dense<0.000000e+00> : vector<8x128xf32>
    %488 = tpu.matmul %240, %487, %cst_69 {dimension_numbers = #tpu.dot_dimension_numbers<[1], [0], [0], [1], [0, 0, 1, 1], [], []>} : vector<8x32xf32>, vector<32x128xf32>, vector<8x128xf32> -> vector<8x128xf32>
    %489 = vector.extract_strided_slice %486 {offsets = [32, 0], sizes = [32, 128], strides = [1, 1]} : vector<128x128xf32> to vector<32x128xf32>
    %cst_70 = arith.constant dense<0.000000e+00> : vector<8x128xf32>
    %490 = tpu.matmul %241, %489, %cst_70 {dimension_numbers = #tpu.dot_dimension_numbers<[1], [0], [0], [1], [0, 0, 1, 1], [], []>} : vector<8x32xf32>, vector<32x128xf32>, vector<8x128xf32> -> vector<8x128xf32>
    %491 = arith.addf %488, %490 : vector<8x128xf32>
    %492 = vector.extract_strided_slice %486 {offsets = [64, 0], sizes = [32, 128], strides = [1, 1]} : vector<128x128xf32> to vector<32x128xf32>
    %cst_71 = arith.constant dense<0.000000e+00> : vector<8x128xf32>
    %493 = tpu.matmul %484, %492, %cst_71 {dimension_numbers = #tpu.dot_dimension_numbers<[1], [0], [0], [1], [0, 0, 1, 1], [], []>} : vector<8x32xf32>, vector<32x128xf32>, vector<8x128xf32> -> vector<8x128xf32>
    %494 = arith.addf %491, %493 : vector<8x128xf32>
    %495 = vector.extract_strided_slice %486 {offsets = [96, 0], sizes = [32, 128], strides = [1, 1]} : vector<128x128xf32> to vector<32x128xf32>
    %cst_72 = arith.constant dense<0.000000e+00> : vector<8x128xf32>
    %496 = tpu.matmul %485, %495, %cst_72 {dimension_numbers = #tpu.dot_dimension_numbers<[1], [0], [0], [1], [0, 0, 1, 1], [], []>} : vector<8x32xf32>, vector<32x128xf32>, vector<8x128xf32> -> vector<8x128xf32>
    %497 = arith.addf %494, %496 : vector<8x128xf32>
    %c0_73 = arith.constant 0 : index
    %c0_74 = arith.constant 0 : index
    %498 = vector.load %arg11[%c0_73, %c0_74] : memref<1x128xf32, #tpu.memory_space<vmem>>, vector<1x128xf32>
    %499 = vector.broadcast %498 : vector<1x128xf32> to vector<8x128xf32>
    %500 = arith.addf %497, %499 : vector<8x128xf32>
    %c0_75 = arith.constant 0 : index
    %c0_76 = arith.constant 0 : index
    %501 = vector.load %arg12[%c0_75, %c0_76] : memref<1x128xf32, #tpu.memory_space<vmem>>, vector<1x128xf32>
    %502 = vector.broadcast %501 : vector<1x128xf32> to vector<8x128xf32>
    %503 = arith.mulf %500, %502 : vector<8x128xf32>
    %c0_77 = arith.constant 0 : index
    %c0_78 = arith.constant 0 : index
    %504 = vector.load %arg13[%c0_77, %c0_78] : memref<1x128xf32, #tpu.memory_space<vmem>>, vector<1x128xf32>
    %505 = vector.broadcast %504 : vector<1x128xf32> to vector<8x128xf32>
    %506 = arith.addf %503, %505 : vector<8x128xf32>
    %cst_79 = arith.constant 0.000000e+00 : f32
    %507 = vector.broadcast %cst_79 : f32 to vector<8x128xf32>
    %508 = arith.maximumf %506, %507 : vector<8x128xf32>
    %c0_80 = arith.constant 0 : index
    %c0_81 = arith.constant 0 : index
    %509 = vector.load %arg14[%c0_80, %c0_81] : memref<128x128xf32, #tpu.memory_space<vmem>>, vector<128x128xf32>
    %cst_82 = arith.constant dense<0.000000e+00> : vector<8x128xf32>
    %510 = tpu.matmul %508, %509, %cst_82 {dimension_numbers = #tpu.dot_dimension_numbers<[1], [0], [0], [1], [0, 0, 1, 1], [], []>} : vector<8x128xf32>, vector<128x128xf32>, vector<8x128xf32> -> vector<8x128xf32>
    %c0_83 = arith.constant 0 : index
    %c0_84 = arith.constant 0 : index
    %511 = vector.load %arg15[%c0_83, %c0_84] : memref<1x128xf32, #tpu.memory_space<vmem>>, vector<1x128xf32>
    %512 = vector.broadcast %511 : vector<1x128xf32> to vector<8x128xf32>
    %513 = arith.addf %510, %512 : vector<8x128xf32>
    %cst_85 = arith.constant dense<0xFF800000> : vector<8xf32>
    %514 = vector.multi_reduction <maximumf>, %513, %cst_85 [1] : vector<8x128xf32> to vector<8xf32>
    %515 = vector.shape_cast %514 : vector<8xf32> to vector<8x1xf32>
    %516 = vector.broadcast %515 : vector<8x1xf32> to vector<8x128xf32>
    %517 = arith.subf %513, %516 : vector<8x128xf32>
    %518 = math.exp %517 : vector<8x128xf32>
    %cst_86 = arith.constant dense<0.000000e+00> : vector<8xf32>
    %519 = vector.multi_reduction <add>, %518, %cst_86 [1] : vector<8x128xf32> to vector<8xf32>
    %520 = vector.shape_cast %519 : vector<8xf32> to vector<8x1xf32>
    %521 = math.log %520 : vector<8x1xf32>
    %522 = arith.addf %521, %515 : vector<8x1xf32>
    %523 = vector.broadcast %522 : vector<8x1xf32> to vector<8x128xf32>
    %524 = arith.subf %513, %523 : vector<8x128xf32>
    %c0_87 = arith.constant 0 : index
    %c0_88 = arith.constant 0 : index
    %525 = vector.load %arg16[%c0_87, %c0_88] : memref<8x128xf32, #tpu.memory_space<vmem>>, vector<8x128xf32>
    tpu.vector_store %arg16[%c0_87, %c0_88], %524 {strides = array<i32>} : memref<8x128xf32, #tpu.memory_space<vmem>>, vector<8x128xf32>,
    return
  }
}

</mosaic_0001>

<bundles_post_ra>
// kernel: forward.1
= control target key start
LH: loop header
LB: loop body
LE: loop exit
PB: predicated region body
PF: predicated region fallthrough
CT: control target
= control target key end

     0   :  { %vm100_vm0 = vcmask 1041408   ;;  %v3265_v1 = vmov 0   ;;  %vm93_vm1 = vcmask 31744   ;;  %v54_v6 = vlaneseq  ;;  %s3267_s22 = smov 64   ;;  %s4067_s1 = inlined_call_operand.vmem [shape: bf16[4,256], index: 1, kind: input, shape index: {}]   ;;  %s4068_s0 = inlined_call_operand.vmem [shape: bf16[32,4], index: 0, kind: input, shape index: {}]   ;;  %s4069_s3 = inlined_call_operand.vmem [shape: f32[1,256], index: 3, kind: input, shape index: {}]   ;;  %s4070_s2 = inlined_call_operand.vmem [shape: bf16[32,256], index: 2, kind: input, shape index: {}]   ;;  %s4071_s7 = inlined_call_operand.vmem [shape: f32[1,64], index: 7, kind: input, shape index: {}]   ;;  %s4072_s9 = inlined_call_operand.vmem [shape: f32[8,32], index: 9, kind: input, shape index: {}]   ;;  %s4073_s4 = inlined_call_operand.vmem [shape: bf16[64,256], index: 4, kind: input, shape index: {}]   ;;  %s4074_s6 = inlined_call_operand.vmem [shape: f32[1,256], index: 6, kind: input, shape index: {}]   ;;  %s4075_s5 = inlined_call_operand.vmem [shape: bf16[32,256], index: 5, kind: input, shape index: {}]   ;;  %s4076_s8 = inlined_call_operand.vmem [shape: f32[1,64], index: 8, kind: input, shape index: {}]   ;;  %s4077_s10 = inlined_call_operand.vmem [shape: f32[128,128], index: 10, kind: input, shape index: {}]   ;;  %s4078_s14 = inlined_call_operand.vmem [shape: f32[128,128], index: 14, kind: input, shape index: {}]   ;;  %s4079_s11 = inlined_call_operand.vmem [shape: f32[1,128], index: 11, kind: input, shape index: {}]   ;;  %s4080_s12 = inlined_call_operand.vmem [shape: f32[1,128], index: 12, kind: input, shape index: {}]   ;;  %s4081_s13 = inlined_call_operand.vmem [shape: f32[1,128], index: 13, kind: input, shape index: {}]   ;;  %s4082_s15 = inlined_call_operand.vmem [shape: f32[1,128], index: 15, kind: input, shape index: {}]   ;;  %s4083_s16 = inlined_call_operand.vmem [shape: f32[8,128], index: 16, kind: output, shape index: {}]  }
   0x1   :  { %4084 = sst [smem:[#allocation2_spill]] %s4067_s1  ;;  %139 = vmatprep.mubr.bf16.mxu1 %v3265_v1  ;;  %427 = vmatprep.mubr.bf16.mxu0 %v3265_v1  ;;  %v3099_v4 = vld [vmem:[%s4068_s0] sm:$0xff]   ;;  %v3100_v5 = vld [vmem:[%s4068_s0 + $0x8] sm:$0xff]   ;;  %vm164_vm2 = vcmask 1043456   ;;  %s3266_s0 = smov 32   ;;  %vm239_vm3 = vcmask 261120  }
   0x2   :  { %s4085_s23 = sld [smem:[#allocation2_spill]]  ;;  %v3369_v7 = vshrl.u32 %v54_v6, 7  ;;  %v62_v9 = vld [vmem:[%s4069_s3] sm:$0x3]  ;;  %v3405_v52 = vld [vmem:[%s4070_s2 + $0x14] ss:$8 sps:$4 sm:$0xff]  }
   0x3   :  { %v3410_v53 = vld [vmem:[%s4070_s2 + $0x10] ss:$8 sps:$4 sm:$0xff]   ;;  %v3416_v54 = vld [vmem:[%s4070_s2 + $0x4] ss:$8 sps:$4 sm:$0xff]   ;;  %407 = vmatprep.subr.bf16.mxu0 %v3405_v52  ;;  %v3423_v55 = vld [vmem:[%s4070_s2] ss:$8 sps:$4 sm:$0xff]  }
   0x4   :  { %v70_v8 = vsub.s32 1, %v3369_v7  ;;  %v3376_v10 = vsub.s32 0, %v3369_v7  ;;  %408 = vmatpush1.bf16.msra.mxu0 %v3410_v53  ;;  %vm56_vm4 = vcmp.lt.s32.totalorder %v3369_v7, 4  ;;  %vm3269_vm5 = vmmov 0  }
   0x5   :  { %409 = vmatprep.subr.bf16.mxu0 %v3416_v54 }
   0x6   :  { %v71_v11 = vrot.slane %v62_v9, %v70_v8  ;;  %v67_v14 = vrot.slane %v62_v9, %v3376_v10 }
   0x8   :  { %v2763_v0 = vld.sshfl [vmem:[%s4085_s23] sm:$0x33 pattern:$0x76325410]  ;;  %410 = vmatpush1.bf16.msra.mxu0 %v3423_v55 }
   0x9   :  { %v92_v2 = vcombine.high %v2763_v0, %v2763_v0  ;;  %v102_v3 = vsel %vm100_vm0, %v2763_v0, 0  ;;  %555 = vmatprep.subr.bf16.mxu0 %v3405_v52 }
   0xb   :  { %2764 = vmatprep.subr.msk.bf16.mxu1 %vm100_vm0, %v92_v2 }
   0xc   :  { %122 = vmatpush1.bf16.msra.mxu1 %v102_v3 }
   0xd   :  { %255 = vmatprep.subr.bf16.mxu1 %v3405_v52 }
   0xf   :  { %2765 = vmatmul.mubr.msk.bf16.vlgmr.msra.gmra.mxu1 %vm93_vm1, %v3099_v4 }
  0x10   :  { %149 = vmatprep.mubr.bf16.mxu1 %v3265_v1  ;;  %256 = vmatpush1.bf16.msra.mxu1 %v3410_v53 }
  0x11   :  { %257 = vmatprep.subr.bf16.mxu1 %v3416_v54 }
  0x14   :  { %258 = vmatpush1.bf16.msra.mxu1 %v3423_v55 }
  0x15   :  { %333 = vmatprep.subr.bf16.mxu1 %v3405_v52 }
  0x17   :  { %2766 = vmatmul.mubr.msk.bf16.gmra.mxu1 %vm93_vm1, %v3100_v5 }
  0x18   :  { %275 = vmatprep.mubr.bf16.mxu1 %v3265_v1 }
  0xcf   :  { %v141_v12 = vpop.f32.mrf.mxu1 }
  0xd0   :  { %v142_v27 = vadd.f32 %v141_v12, %v67_v14 }
  0xd1   :  { %v143_v13 = vpop.f32.mrf.mxu1 }
  0xd2   :  { %v144_v15 = vadd.f32 %v143_v13, %v71_v11  ;;  %v167_v40 = vrot.slane %v142_v27, 4 }
  0xd3   :  { %v145_v16 = vpop.f32.mrf.mxu1 }
  0xd4   :  { %v146_v17 = vadd.f32 %v145_v16, %v67_v14  ;;  %v194_v34 = vrot.slane %v144_v15, 4 }
  0xd5   :  { %v147_v18 = vpop.f32.mrf.mxu1 }
  0xd6   :  { %v148_v19 = vadd.f32 %v147_v18, %v71_v11  ;;  %v175_v28 = vrot.slane %v146_v17, 4 }
  0xd7   :  { %v151_v20 = vpop.f32.mrf.mxu1 }
  0xd8   :  { %v152_v21 = vadd.f32 %v151_v20, %v67_v14  ;;  %v186_v23 = vrot.slane %v148_v19, 4 }
  0xd9   :  { %v153_v22 = vpop.f32.mrf.mxu1 }
  0xda   :  { %v183_v24 = vrot.slane %v152_v21, 4  ;;  %v154_v25 = vadd.f32 %v153_v22, %v71_v11  ;;  %v3382_v26 = vsel %vm164_vm2, %v152_v21, %v148_v19 }
  0xdb   :  { %v155_v29 = vpop.f32.mrf.mxu1 }
  0xdc   :  { %v178_v30 = vrot.slane %v154_v25, 4  ;;  %v156_v31 = vadd.f32 %v155_v29, %v67_v14  ;;  %v3385_v32 = vsel %vm164_vm2, %v146_v17, %v154_v25  ;;  %v3388_v33 = vsel %vm164_vm2, %v183_v24, %v186_v23 }
  0xdd   :  { %v157_v35 = vpop.f32.mrf.mxu1 }
  0xde   :  { %v191_v36 = vrot.slane %v156_v31, 4  ;;  %v158_v37 = vadd.f32 %v157_v35, %v71_v11  ;;  %v3391_v38 = vsel %vm164_vm2, %v175_v28, %v178_v30  ;;  %v3394_v39 = vsel %vm164_vm2, %v156_v31, %v144_v15 }
  0xe0   :  { %v165_v41 = vsel %vm164_vm2, %v142_v27, %v158_v37  ;;  %v170_v42 = vrot.slane %v158_v37, 4  ;;  %v3398_v43 = vsel %vm164_vm2, %v191_v36, %v194_v34 }
  0xe1   :  { %3125 = vtanh.f32 %v165_v41  ;;  %v2767_v46 = vmul.f32 -1.442695, %v165_v41 }
  0xe2   :  { %v172_v44 = vsel %vm164_vm2, %v167_v40, %v170_v42 }
  0xe3   :  { %3127 = vpow2.f32 %v2767_v46 }
  0xee   :  { %v3126_v45 = vpop.eup %3125 }
  0xef   :  { %205 = vrot.lane.b32.xlu0 %v3126_v45, %s3266_s0 }
  0xf0   :  { %v3128_v47 = vpop.eup %3127 }
  0xf1   :  { %v200_v48 = vadd.f32 1.0, %v3128_v47 }
  0xf3   :  { %3129 = vrcp.f32 %v200_v48 }
 0x100   :  { %v3130_v49 = vpop.eup %3129 }
 0x161   :  { %v206_v50 = vpop.permute.xlu0 %205 }
 0x162   :  { %v208_v51 = vmul.f32 %v3130_v49, %v206_v50 }
 0x164   :  { %3131 = vtanh.f32 %v208_v51 }
 0x171   :  { %v3132_v56 = vpop.eup %3131 }
 0x172   :  { %211 = vrot.lane.b32.xlu0 %v3132_v56, %s3267_s22 }
 0x176   :  { %294 = vrot.lane.b32.xlu0 %v208_v51, %s3266_s0 }
 0x1e4   :  { %v212_v57 = vpop.permute.xlu0 %211 }
 0x1e5   :  { %v3434_v58 = vmul.f32 %v3130_v49, %v212_v57 }
 0x1e7   :  { %v215_v59 = vpack.c.bf16 %v3434_v58, %v3434_v58 }
 0x1e8   :  { %v295_v14 = vpop.permute.xlu0 %294 }
 0x1e9   :  { %217 = vrot.lane.b32.xlu1 %v215_v59, %s3267_s22 }
 0x25b   :  { %v218_v60 = vpop.permute.xlu1 %217 }
 0x25c   :  { %2772 = vmatmul.mubr.msk.bf16.vlgmr.msra.gmra.mxu1 %vm239_vm3, %v218_v60 }
 0x25d   :  { %334 = vmatpush1.bf16.msra.mxu1 %v3410_v53  ;;  %353 = vmatprep.mubr.bf16.mxu1 %v3265_v1 }
 0x25e   :  { %335 = vmatprep.subr.bf16.mxu1 %v3416_v54 }
 0x261   :  { %336 = vmatpush1.bf16.msra.mxu1 %v3423_v55 }
 0x262   :  { %481 = vmatprep.subr.bf16.mxu1 %v3405_v52 }
 0x31c   :  { %v277_v61 = vpop.f32.mrf.mxu1 }
 0x31e   :  { %v279_v62 = vpop.f32.mrf.mxu1 }
 0x31f   :  { %v284_v63 = vsel %vm56_vm4, %v277_v61, %v279_v62 }
 0x320   :  { %v285_v0 = vadd.f32 %v284_v63, %v172_v44  ;;  %v281_v2 = vpop.f32.mrf.mxu1 }
 0x322   :  { %3133 = vtanh.f32 %v285_v0  ;;  %v282_v3 = vpop.f32.mrf.mxu1  ;;  %v2773_v5 = vmul.f32 -1.442695, %v285_v0 }
 0x324   :  { %3135 = vpow2.f32 %v2773_v5 }
 0x32f   :  { %v3134_v4 = vpop.eup %3133 }
 0x330   :  { %299 = vrot.lane.b32.xlu1 %v3134_v4, %s3266_s0 }
 0x331   :  { %v3136_v6 = vpop.eup %3135 }
 0x332   :  { %v289_v9 = vadd.f32 1.0, %v3136_v6 }
 0x334   :  { %3137 = vrcp.f32 %v289_v9 }
 0x341   :  { %v3138_v11 = vpop.eup %3137 }
 0x342   :  { %v297_v15 = vmul.f32 %v3138_v11, %v295_v14 }
 0x3a2   :  { %v300_v12 = vpop.permute.xlu1 %299 }
 0x3a3   :  { %v302_v13 = vmul.f32 %v3138_v11, %v300_v12 }
 0x3a5   :  { %304 = vrot.lane.b32.xlu1 %v302_v13, %s3266_s0 }
 0x417   :  { %v305_v16 = vpop.permute.xlu1 %304 }
 0x418   :  { %v307_v17 = vadd.f32 %v305_v16, %v297_v15 }
 0x41a   :  { %3139 = vtanh.f32 %v307_v17 }
 0x427   :  { %v3140_v18 = vpop.eup %3139 }
 0x428   :  { %310 = vrot.lane.b32.xlu0 %v3140_v18, %s3266_s0 }
 0x49a   :  { %v311_v19 = vpop.permute.xlu0 %310 }
 0x49b   :  { %v3451_v20 = vmul.f32 %v3138_v11, %v311_v19 }
 0x49d   :  { %v314_v21 = vpack.c.bf16 %v3451_v20, %v3451_v20 }
 0x49f   :  { %316 = vrot.lane.b32.xlu1 %v314_v21, %s3267_s22 }
 0x511   :  { %v317_v22 = vpop.permute.xlu1 %316 }
 0x512   :  { %2774 = vmatmul.mubr.msk.bf16.vlgmr.msra.gmra.mxu1 %vm239_vm3, %v317_v22 }
 0x513   :  { %482 = vmatpush1.bf16.msra.mxu1 %v3410_v53  ;;  %501 = vmatprep.mubr.bf16.mxu1 %v3265_v1 }
 0x514   :  { %483 = vmatprep.subr.bf16.mxu1 %v3416_v54 }
 0x517   :  { %484 = vmatpush1.bf16.msra.mxu1 %v3423_v55 }
 0x518   :  { %629 = vmatprep.subr.bf16.mxu1 %v3405_v52 }
 0x5d2   :  { %v355_v23 = vpop.f32.mrf.mxu1 }
 0x5d4   :  { %v357_v24 = vpop.f32.mrf.mxu1 }
 0x5d5   :  { %v362_v25 = vsel %vm56_vm4, %v355_v23, %v357_v24 }
 0x5d6   :  { %v363_v27 = vadd.f32 %v362_v25, %v3385_v32  ;;  %v359_v28 = vpop.f32.mrf.mxu1 }
 0x5d8   :  { %3141 = vtanh.f32 %v363_v27  ;;  %v360_v29 = vpop.f32.mrf.mxu1  ;;  %v2775_v31 = vmul.f32 -1.442695, %v363_v27 }
 0x5da   :  { %3143 = vpow2.f32 %v2775_v31 }
 0x5e5   :  { %v3142_v30 = vpop.eup %3141 }
 0x5e6   :  { %373 = vrot.lane.b32.xlu0 %v3142_v30, %s3266_s0 }
 0x5e7   :  { %v3144_v34 = vpop.eup %3143 }
 0x5e8   :  { %v367_v35 = vadd.f32 1.0, %v3144_v34 }
 0x5ea   :  { %3145 = vrcp.f32 %v367_v35 }
 0x5f7   :  { %v3146_v36 = vpop.eup %3145 }
 0x5f8   :  { %v371_v41 = vmul.f32 %v3146_v36, %v307_v17 }
 0x658   :  { %v374_v37 = vpop.permute.xlu0 %373 }
 0x659   :  { %v376_v40 = vmul.f32 %v3146_v36, %v374_v37 }
 0x65b   :  { %378 = vrot.lane.b32.xlu1 %v376_v40, %s3266_s0 }
 0x6cd   :  { %v379_v42 = vpop.permute.xlu1 %378 }
 0x6ce   :  { %v381_v44 = vadd.f32 %v379_v42, %v371_v41 }
 0x6d0   :  { %3147 = vtanh.f32 %v381_v44 }
 0x6dd   :  { %v3148_v32 = vpop.eup %3147 }
 0x6de   :  { %384 = vrot.lane.b32.xlu0 %v3148_v32, %s3266_s0 }
 0x750   :  { %v385_v45 = vpop.permute.xlu0 %384 }
 0x751   :  { %v3468_v46 = vmul.f32 %v3146_v36, %v385_v45 }
 0x753   :  { %v388_v47 = vpack.c.bf16 %v3468_v46, %v3468_v46 }
 0x755   :  { %390 = vrot.lane.b32.xlu1 %v388_v47, %s3267_s22 }
 0x7c7   :  { %v391_v48 = vpop.permute.xlu1 %390 }
 0x7c8   :  { %2776 = vmatmul.mubr.msk.bf16.vlgmr.msra.gmra.mxu0 %vm239_vm3, %v391_v48 }
 0x7c9   :  { %556 = vmatpush1.bf16.msra.mxu0 %v3410_v53  ;;  %575 = vmatprep.mubr.bf16.mxu0 %v3265_v1 }
 0x7ca   :  { %557 = vmatprep.subr.bf16.mxu0 %v3416_v54 }
 0x7cd   :  { %558 = vmatpush1.bf16.msra.mxu0 %v3423_v55 }
 0x7ce   :  { %703 = vmatprep.subr.bf16.mxu0 %v3405_v52 }
 0x888   :  { %v429_v49 = vpop.f32.mrf.mxu0 }
 0x88a   :  { %v431_v50 = vpop.f32.mrf.mxu0 }
 0x88b   :  { %v436_v51 = vsel %vm56_vm4, %v429_v49, %v431_v50 }
 0x88c   :  { %v437_v56 = vadd.f32 %v436_v51, %v3391_v38  ;;  %v433_v57 = vpop.f32.mrf.mxu0 }
 0x88e   :  { %3149 = vtanh.f32 %v437_v56  ;;  %v434_v59 = vpop.f32.mrf.mxu0  ;;  %v2777_v61 = vmul.f32 -1.442695, %v437_v56 }
 0x890   :  { %3151 = vpow2.f32 %v2777_v61 }
 0x89b   :  { %v3150_v60 = vpop.eup %3149 }
 0x89c   :  { %447 = vrot.lane.b32.xlu0 %v3150_v60, %s3266_s0 }
 0x89d   :  { %v3152_v62 = vpop.eup %3151 }
 0x89e   :  { %v441_v63 = vadd.f32 1.0, %v3152_v62 }
 0x8a0   :  { %3153 = vrcp.f32 %v441_v63 }
 0x8ad   :  { %v3154_v0 = vpop.eup %3153 }
 0x8ae   :  { %v445_v3 = vmul.f32 %v3154_v0, %v381_v44 }
 0x90e   :  { %v448_v52 = vpop.permute.xlu0 %447 }
 0x90f   :  { %v450_v2 = vmul.f32 %v3154_v0, %v448_v52 }
 0x911   :  { %452 = vrot.lane.b32.xlu1 %v450_v2, %s3266_s0 }
 0x983   :  { %v453_v4 = vpop.permute.xlu1 %452 }
 0x984   :  { %v455_v5 = vadd.f32 %v453_v4, %v445_v3 }
 0x986   :  { %3155 = vtanh.f32 %v455_v5 }
 0x993   :  { %v3156_v38 = vpop.eup %3155 }
 0x994   :  { %458 = vrot.lane.b32.xlu0 %v3156_v38, %s3266_s0 }
 0xa06   :  { %v459_v6 = vpop.permute.xlu0 %458 }
 0xa07   :  { %v3485_v9 = vmul.f32 %v3154_v0, %v459_v6 }
 0xa09   :  { %v462_v11 = vpack.c.bf16 %v3485_v9, %v3485_v9 }
 0xa0b   :  { %464 = vrot.lane.b32.xlu1 %v462_v11, %s3267_s22 }
 0xa7d   :  { %v465_v12 = vpop.permute.xlu1 %464 }
 0xa7e   :  { %2778 = vmatmul.mubr.msk.bf16.vlgmr.msra.gmra.mxu1 %vm239_vm3, %v465_v12 }
 0xa7f   :  { %630 = vmatpush1.bf16.msra.mxu1 %v3410_v53  ;;  %649 = vmatprep.mubr.bf16.mxu1 %v3265_v1 }
 0xa80   :  { %631 = vmatprep.subr.bf16.mxu1 %v3416_v54 }
 0xa83   :  { %632 = vmatpush1.bf16.msra.mxu1 %v3423_v55 }
 0xb3e   :  { %v503_v13 = vpop.f32.mrf.mxu1 }
 0xb40   :  { %v505_v14 = vpop.f32.mrf.mxu1 }
 0xb41   :  { %v510_v15 = vsel %vm56_vm4, %v503_v13, %v505_v14 }
 0xb42   :  { %v511_v16 = vadd.f32 %v510_v15, %v3382_v26  ;;  %v507_v17 = vpop.f32.mrf.mxu1 }
 0xb44   :  { %3157 = vtanh.f32 %v511_v16  ;;  %v508_v18 = vpop.f32.mrf.mxu1  ;;  %v2779_v21 = vmul.f32 -1.442695, %v511_v16 }
 0xb46   :  { %3159 = vpow2.f32 %v2779_v21 }
 0xb51   :  { %v3158_v19 = vpop.eup %3157 }
 0xb52   :  { %521 = vrot.lane.b32.xlu0 %v3158_v19, %s3266_s0 }
 0xb53   :  { %v3160_v22 = vpop.eup %3159 }
 0xb54   :  { %v515_v23 = vadd.f32 1.0, %v3160_v22 }
 0xb56   :  { %3161 = vrcp.f32 %v515_v23 }
 0xb63   :  { %v3162_v24 = vpop.eup %3161 }
 0xb64   :  { %v519_v28 = vmul.f32 %v3162_v24, %v455_v5 }
 0xbc4   :  { %v522_v25 = vpop.permute.xlu0 %521 }
 0xbc5   :  { %v524_v27 = vmul.f32 %v3162_v24, %v522_v25 }
 0xbc7   :  { %526 = vrot.lane.b32.xlu1 %v524_v27, %s3266_s0 }
 0xc39   :  { %v527_v29 = vpop.permute.xlu1 %526 }
 0xc3a   :  { %v529_v30 = vadd.f32 %v527_v29, %v519_v28 }
 0xc3c   :  { %3163 = vtanh.f32 %v529_v30 }
 0xc49   :  { %v3164_v26 = vpop.eup %3163 }
 0xc4a   :  { %532 = vrot.lane.b32.xlu0 %v3164_v26, %s3266_s0 }
 0xcbc   :  { %v533_v31 = vpop.permute.xlu0 %532 }
 0xcbd   :  { %v3501_v34 = vmul.f32 %v3162_v24, %v533_v31 }
 0xcbf   :  { %v536_v35 = vpack.c.bf16 %v3501_v34, %v3501_v34 }
 0xcc1   :  { %538 = vrot.lane.b32.xlu1 %v536_v35, %s3267_s22  ;;  %v3268_v35 = vmov 0.0  }
 0xcc2   :  { %2926 = vmatprep.subr.mxu1 %v3268_v35 }
 0xd33   :  { %v539_v36 = vpop.permute.xlu1 %538 }
 0xd34   :  { %2780 = vmatmul.mubr.msk.bf16.vlgmr.msra.gmra.mxu0 %vm239_vm3, %v539_v36 }
 0xd35   :  { %704 = vmatpush1.bf16.msra.mxu0 %v3410_v53  ;;  %723 = vmatprep.mubr.bf16.mxu0 %v3265_v1 }
 0xd36   :  { %705 = vmatprep.subr.bf16.mxu0 %v3416_v54 }
 0xd39   :  { %706 = vmatpush1.bf16.msra.mxu0 %v3423_v55 }
 0xd3a   :  { %2937 = vmatprep.subr.mxu0 %v3268_v35 }
 0xdf4   :  { %v577_v37 = vpop.f32.mrf.mxu0 }
 0xdf6   :  { %v579_v40 = vpop.f32.mrf.mxu0 }
 0xdf7   :  { %v584_v41 = vsel %vm56_vm4, %v577_v37, %v579_v40 }
 0xdf8   :  { %v585_v42 = vadd.f32 %v584_v41, %v3388_v33  ;;  %v581_v44 = vpop.f32.mrf.mxu0  ;;  %v762_v41 = vrot.slane %v3485_v9, 4 }
 0xdfa   :  { %3165 = vtanh.f32 %v585_v42  ;;  %v582_v32 = vpop.f32.mrf.mxu0  ;;  %v2781_v53 = vmul.f32 -1.442695, %v585_v42 }
 0xdfb   :  { %v3549_v32 = vsel %vm164_vm2, %v762_v41, %v3468_v46 }
 0xdfc   :  { %3167 = vpow2.f32 %v2781_v53 }
 0xe07   :  { %v3166_v45 = vpop.eup %3165 }
 0xe08   :  { %595 = vrot.lane.b32.xlu0 %v3166_v45, %s3266_s0 }
 0xe09   :  { %v3168_v47 = vpop.eup %3167 }
 0xe0a   :  { %v589_v48 = vadd.f32 1.0, %v3168_v47 }
 0xe0c   :  { %3169 = vrcp.f32 %v589_v48 }
 0xe19   :  { %v3170_v54 = vpop.eup %3169 }
 0xe1a   :  { %v593_v50 = vmul.f32 %v3170_v54, %v529_v30 }
 0xe7a   :  { %v596_v55 = vpop.permute.xlu0 %595 }
 0xe7b   :  { %v598_v49 = vmul.f32 %v3170_v54, %v596_v55 }
 0xe7d   :  { %600 = vrot.lane.b32.xlu1 %v598_v49, %s3266_s0 }
 0xeef   :  { %v601_v51 = vpop.permute.xlu1 %600 }
 0xef0   :  { %v603_v56 = vadd.f32 %v601_v51, %v593_v50 }
 0xef2   :  { %3171 = vtanh.f32 %v603_v56 }
 0xeff   :  { %v3172_v33 = vpop.eup %3171 }
 0xf00   :  { %606 = vrot.lane.b32.xlu0 %v3172_v33, %s3266_s0 }
 0xf72   :  { %v607_v57 = vpop.permute.xlu0 %606 }
 0xf73   :  { %v3517_v59 = vmul.f32 %v3170_v54, %v607_v57 }
 0xf75   :  { %v610_v60 = vpack.c.bf16 %v3517_v59, %v3517_v59  ;;  %v765_v44 = vrot.slane %v3517_v59, 4 }
 0xf77   :  { %612 = vrot.lane.b32.xlu1 %v610_v60, %s3267_s22  ;;  %v3579_v59 = vsel %vm164_vm2, %v3501_v34, %v765_v44 }
 0xfe9   :  { %v613_v61 = vpop.permute.xlu1 %612 }
 0xfea   :  { %2782 = vmatmul.mubr.msk.bf16.vlgmr.msra.gmra.mxu1 %vm239_vm3, %v613_v61 }
 0xfeb   :  { %2934 = vmatprep.mubr.msk.f32.mxu1 %vm3269_vm5, %v3268_v35 }
0x10aa   :  { %v651_v62 = vpop.f32.mrf.mxu1 }
0x10ac   :  { %v653_v63 = vpop.f32.mrf.mxu1 }
0x10ad   :  { %v658_v0 = vsel %vm56_vm4, %v651_v62, %v653_v63 }
0x10ae   :  { %v659_v52 = vadd.f32 %v658_v0, %v3394_v39  ;;  %v655_v2 = vpop.f32.mrf.mxu1 }
0x10b0   :  { %3173 = vtanh.f32 %v659_v52  ;;  %v656_v3 = vpop.f32.mrf.mxu1  ;;  %v2783_v5 = vmul.f32 -1.442695, %v659_v52 }
0x10b2   :  { %3175 = vpow2.f32 %v2783_v5 }
0x10bd   :  { %v3174_v4 = vpop.eup %3173 }
0x10be   :  { %669 = vrot.lane.b32.xlu0 %v3174_v4, %s3266_s0 }
0x10bf   :  { %v3176_v38 = vpop.eup %3175 }
0x10c0   :  { %v663_v6 = vadd.f32 1.0, %v3176_v38 }
0x10c2   :  { %3177 = vrcp.f32 %v663_v6 }
0x10cf   :  { %v3178_v11 = vpop.eup %3177 }
0x10d0   :  { %v667_v14 = vmul.f32 %v3178_v11, %v603_v56  ;;  %v778_v56 = vld [vmem:[%s4071_s7] sm:$0x1]  ;;  %s3270_s7 = smov 96  }
0x10d1   :  { %v783_v60 = vrot.slane %v778_v56, %v3376_v10 }
0x1130   :  { %v670_v12 = vpop.permute.xlu0 %669 }
0x1131   :  { %v672_v13 = vmul.f32 %v3178_v11, %v670_v12  ;;  %v3621_v12 = vld [vmem:[%s4072_s9] sm:$0xff] }
0x1133   :  { %674 = vrot.lane.b32.xlu1 %v672_v13, %s3266_s0 }
0x11a5   :  { %v675_v15 = vpop.permute.xlu1 %674 }
0x11a6   :  { %v677_v16 = vadd.f32 %v675_v15, %v667_v14 }
0x11a8   :  { %3179 = vtanh.f32 %v677_v16 }
0x11b5   :  { %v3180_v39 = vpop.eup %3179 }
0x11b6   :  { %680 = vrot.lane.b32.xlu0 %v3180_v39, %s3266_s0 }
0x1228   :  { %v681_v17 = vpop.permute.xlu0 %680 }
0x1229   :  { %v683_v18 = vmul.f32 %v3178_v11, %v681_v17 }
0x122b   :  { %v684_v19 = vpack.c.bf16 %v683_v18, %v683_v18 }
0x122d   :  { %686 = vrot.lane.b32.xlu1 %v684_v19, %s3267_s22 }
0x129f   :  { %v687_v21 = vpop.permute.xlu1 %686 }
0x12a0   :  { %2784 = vmatmul.mubr.msk.bf16.vlgmr.msra.gmra.mxu0 %vm239_vm3, %v687_v21 }
0x12a1   :  { %2945 = vmatprep.mubr.msk.f32.mxu0 %vm3269_vm5, %v3268_v35 }
0x1360   :  { %v725_v22 = vpop.f32.mrf.mxu0 }
0x1362   :  { %v727_v23 = vpop.f32.mrf.mxu0 }
0x1363   :  { %v732_v24 = vsel %vm56_vm4, %v725_v22, %v727_v23 }
0x1364   :  { %v733_v25 = vadd.f32 %v732_v24, %v3398_v43  ;;  %v729_v27 = vpop.f32.mrf.mxu0  ;;  %v759_v43 = vrot.slane %v3451_v20, 4  ;;  %v3555_v20 = vsel %vm164_vm2, %v765_v44, %v3501_v34  ;;  %v771_v34 = vsel %vm164_vm2, %v3468_v46, %v762_v41  ;;  %v3109_v24 = vld [vmem:[%s4073_s4 + $0x34] ss:$8 sps:$4 sm:$0xff]  }
0x1366   :  { %3181 = vtanh.f32 %v733_v25  ;;  %v730_v28 = vpop.f32.mrf.mxu0  ;;  %v2785_v30 = vmul.f32 -1.442695, %v733_v25  ;;  %v3542_v42 = vsel %vm164_vm2, %v759_v43, %v3434_v58  ;;  %v770_v62 = vsel %vm164_vm2, %v3434_v58, %v759_v43  ;;  %v3112_v25 = vld [vmem:[%s4073_s4 + $0x14] ss:$8 sps:$4 sm:$0xff]  }
0x1367   :  { %v1150_v39 = vpack.c.bf16 %v3542_v42, %v3549_v32  ;;  %v1147_v23 = vpack.c.bf16 %v771_v34, %v770_v62 }
0x1368   :  { %3183 = vpow2.f32 %v2785_v30  ;;  %v3110_v30 = vld [vmem:[%s4073_s4 + $0x10] ss:$8 sps:$4 sm:$0xff]  }
0x1373   :  { %v3182_v29 = vpop.eup %3181 }
0x1374   :  { %743 = vrot.lane.b32.xlu0 %v3182_v29, %s3266_s0  ;;  %v3107_v29 = vld [vmem:[%s4073_s4 + $0x30] ss:$8 sps:$4 sm:$0xff]  }
0x1375   :  { %v3184_v26 = vpop.eup %3183 }
0x1376   :  { %v737_v31 = vadd.f32 1.0, %v3184_v26 }
0x1378   :  { %3185 = vrcp.f32 %v737_v31  ;;  %v3115_v31 = vld [vmem:[%s4073_s4 + $0x24] ss:$8 sps:$4 sm:$0xff]  }
0x1385   :  { %v3186_v36 = vpop.eup %3185 }
0x1386   :  { %v741_v9 = vmul.f32 %v3186_v36, %v677_v16 }
0x13e6   :  { %v744_v37 = vpop.permute.xlu0 %743 }
0x13e7   :  { %v746_v40 = vmul.f32 %v3186_v36, %v744_v37  ;;  %v3113_v37 = vld [vmem:[%s4073_s4 + $0x20] ss:$8 sps:$4 sm:$0xff]  }
0x13e9   :  { %748 = vrot.lane.b32.xlu1 %v746_v40, %s3266_s0  ;;  %v3116_v40 = vld [vmem:[%s4073_s4] ss:$8 sps:$4 sm:$0xff]  }
0x13ed   :  { %796 = vrot.lane.b32.xlu1 %v3542_v42, %s3267_s22 }
0x13f1   :  { %794 = vrot.lane.b32.xlu1 %v3549_v32, %s3267_s22 }
0x13f5   :  { %792 = vrot.lane.b32.xlu1 %v3555_v20, %s3267_s22 }
0x145b   :  { %v749_v45 = vpop.permute.xlu1 %748 }
0x145c   :  { %v751_v53 = vadd.f32 %v749_v45, %v741_v9 }
0x145e   :  { %3187 = vtanh.f32 %v751_v53 }
0x145f   :  { %v797_v47 = vpop.permute.xlu1 %796 }
0x1460   :  { %2927 = vmatpush3.xpose.msk.msra.mxu1 %vm239_vm3, %v797_v47 }
0x1461   :  { %2928 = vmatprep.subr.mxu1 %v3268_v35 }
0x1463   :  { %v795_v48 = vpop.permute.xlu1 %794 }
0x1464   :  { %2929 = vmatpush3.xpose.msk.msra.mxu1 %vm239_vm3, %v795_v48 }
0x1465   :  { %2930 = vmatprep.subr.mxu1 %v3268_v35 }
0x1467   :  { %v793_v54 = vpop.permute.xlu1 %792 }
0x1468   :  { %2931 = vmatpush3.xpose.msk.msra.mxu1 %vm239_vm3, %v793_v54 }
0x1469   :  { %2932 = vmatprep.subr.mxu1 %v3268_v35 }
0x146b   :  { %v3188_v55 = vpop.eup %3187 }
0x146c   :  { %754 = vrot.lane.b32.xlu0 %v3188_v55, %s3266_s0 }
0x14de   :  { %v755_v49 = vpop.permute.xlu0 %754 }
0x14df   :  { %v757_v50 = vmul.f32 %v3186_v36, %v755_v49  ;;  %v3118_v36 = vld [vmem:[%s4073_s4 + $0x4] ss:$8 sps:$4 sm:$0xff]  }
0x14e1   :  { %v768_v51 = vrot.slane %v757_v50, 4 }
0x14e3   :  { %v774_v33 = vsel %vm164_vm2, %v768_v51, %v683_v18  ;;  %v3575_v57 = vsel %vm164_vm2, %v683_v18, %v768_v51 }
0x14e4   :  { %790 = vrot.lane.b32.xlu1 %v774_v33, %s3267_s22  ;;  %888 = vrot.lane.b32.xlu0 %v3575_v57, %s3267_s22  ;;  %v1148_v61 = vpack.c.bf16 %v3575_v57, %v3579_v59  ;;  %v1149_v16 = vpack.c.bf16 %v3555_v20, %v774_v33 }
0x14e8   :  { %784 = vrot.lane.b32.xlu1 %v783_v60, %s3270_s7  ;;  %886 = vrot.lane.b32.xlu0 %v3579_v59, %s3267_s22 }
0x14ec   :  { %884 = vrot.lane.b32.xlu0 %v771_v34, %s3267_s22 }
0x14f0   :  { %882 = vrot.lane.b32.xlu0 %v770_v62, %s3267_s22 }
0x1556   :  { %v791_v63 = vpop.permute.xlu1 %790  ;;  %v889_v0 = vpop.permute.xlu0 %888 }
0x1557   :  { %2933 = vmatpush3.xpose.msk.msra.mxu1 %vm239_vm3, %v791_v63  ;;  %2938 = vmatpush3.xpose.msk.msra.mxu0 %vm239_vm3, %v889_v0 }
0x1558   :  { %2948 = vmatprep.subr.mxu1 %v3268_v35  ;;  %2939 = vmatprep.subr.mxu0 %v3268_v35 }
0x155a   :  { %v785_v52 = vpop.permute.xlu1 %784  ;;  %v887_v2 = vpop.permute.xlu0 %886 }
0x155b   :  { %2935 = vmatmul.mubr.msk.f32.vlgmr.msra.gmra.mxu1 %vm239_vm3, %v785_v52  ;;  %2940 = vmatpush3.xpose.msk.msra.mxu0 %vm239_vm3, %v887_v2 }
0x155c   :  { %2949 = vmatpush3.msra.mxu1 %v889_v0  ;;  %2941 = vmatprep.subr.mxu0 %v3268_v35 }
0x155d   :  { %2950 = vmatprep.subr.mxu1 %v3268_v35  ;;  %2956 = vmatprep.mubr.msk.f32.mxu1 %vm3269_vm5, %v3268_v35 }
0x155e   :  { %2951 = vmatpush3.msra.mxu1 %v887_v2  ;;  %v885_v58 = vpop.permute.xlu0 %884 }
0x155f   :  { %2952 = vmatprep.subr.mxu1 %v3268_v35  ;;  %2942 = vmatpush3.xpose.msk.msra.mxu0 %vm239_vm3, %v885_v58 }
0x1560   :  { %2953 = vmatpush3.msra.mxu1 %v885_v58  ;;  %2943 = vmatprep.subr.mxu0 %v3268_v35 }
0x1561   :  { %2954 = vmatprep.subr.mxu1 %v3268_v35 }
0x1562   :  { %v883_v46 = vpop.permute.xlu0 %882 }
0x1563   :  { %2944 = vmatpush3.xpose.msk.msra.mxu0 %vm239_vm3, %v883_v46  ;;  %2955 = vmatpush3.msra.mxu1 %v883_v46 }
0x1564   :  { %2959 = vmatprep.subr.mxu0 %v3268_v35  ;;  %1195 = vmatprep.subr.bf16.mxu1 %v3109_v24 }
0x1566   :  { %2946 = vmatmul.mubr.msk.f32.vlgmr.msra.gmra.mxu0 %vm239_vm3, %v778_v56 }
0x1567   :  { %2960 = vmatpush3.msra.mxu0 %v797_v47  ;;  %2967 = vmatprep.mubr.msk.f32.mxu0 %vm3269_vm5, %v3268_v35 }
0x1568   :  { %2961 = vmatprep.subr.mxu0 %v3268_v35 }
0x1569   :  { %2962 = vmatpush3.msra.mxu0 %v795_v48  ;;  %v1321_v48 = vld [vmem:[%s4074_s6] sm:$0x3] }
0x156a   :  { %2963 = vmatprep.subr.mxu0 %v3268_v35  ;;  %v1326_v33 = vrot.slane %v1321_v48, %v3376_v10 }
0x156b   :  { %2964 = vmatpush3.msra.mxu0 %v793_v54  ;;  %v1330_v54 = vrot.slane %v1321_v48, %v70_v8  ;;  %v3712_v48 = vld [vmem:[%s4075_s5 + $0x10] ss:$8 sps:$4 sm:$0xff]  }
0x156c   :  { %2965 = vmatprep.subr.mxu0 %v3268_v35 }
0x156d   :  { %2966 = vmatpush3.msra.mxu0 %v791_v63 }
0x156e   :  { %1280 = vmatprep.subr.bf16.mxu0 %v3112_v25 }
0x161b   :  { %v874_v3 = vpop.f32.mrf.mxu1 }
0x161d   :  { %v2936_v4 = vpop.f32.mrf.mxu1 }
0x1626   :  { %v966_v5 = vpop.f32.mrf.mxu0 }
0x1627   :  { %v967_v38 = vadd.f32 %v966_v5, %v874_v3 }
0x1628   :  { %v2947_v6 = vpop.f32.mrf.mxu0 }
0x1629   :  { %v970_v11 = vmax.f32 %v967_v38, 0.0 }
0x162b   :  { %v974_v13 = vrot.slane %v970_v11, %v3376_v10 }
0x162d   :  { %v976_v14 = vadd.f32 %v3621_v12, %v974_v13 }
0x162f   :  { %v977_v15 = vsel %vm239_vm3, %v976_v14, -inf }
0x1630   :  { %978 = vmax.xlane.f32.xlu0 %v977_v15 }
0x1646   :  { %1153 = vrot.lane.b32.xlu0 %v1149_v16, %s3267_s22 }
0x164a   :  { %1155 = vrot.lane.b32.xlu0 %v1150_v39, %s3267_s22 }
0x16b9   :  { %v979_v17 = vpop.xlane.xlu0 %978 }
0x16ba   :  { %v980_v18 = vsub.f32 %v976_v14, %v979_v17 }
0x16bc   :  { %v981_v19 = vmul.f32 1.442695, %v980_v18 }
0x16bd   :  { %v1154_v43 = vpop.permute.xlu0 %1153 }
0x16be   :  { %3189 = vpow2.f32 %v981_v19 }
0x16c1   :  { %v1156_v42 = vpop.permute.xlu0 %1155 }
0x16cb   :  { %v3190_v21 = vpop.eup %3189 }
0x16cc   :  { %v983_v22 = vsel %vm239_vm3, %v3190_v21, 0.0 }
0x16cd   :  { %984 = vadd.xlane.f32.xlu1 %v983_v22 }
0x16de   :  { %1238 = vrot.lane.b32.xlu1 %v1147_v23, %s3267_s22 }
0x16e2   :  { %1240 = vrot.lane.b32.xlu1 %v1148_v61, %s3267_s22 }
0x1756   :  { %v985_v27 = vpop.xlane.xlu1 %984 }
0x1757   :  { %3191 = vrcp.f32 %v985_v27 }
0x175a   :  { %v1239_v41 = vpop.permute.xlu1 %1238 }
0x175e   :  { %v1241_v44 = vpop.permute.xlu1 %1240 }
0x1764   :  { %v3192_v28 = vpop.eup %3191 }
0x1765   :  { %v987_v26 = vmul.f32 %v3192_v28, %v3190_v21 }
0x1767   :  { %2957 = vmatmul.mubr.msk.f32.vlgmr.msra.gmra.mxu1 %vm239_vm3, %v987_v26  ;;  %2968 = vmatmul.mubr.msk.f32.vlgmr.msra.gmra.mxu0 %vm239_vm3, %v987_v26 }
0x1768   :  { %1196 = vmatpush1.bf16.msra.mxu1 %v3107_v29  ;;  %1281 = vmatpush1.bf16.msra.mxu0 %v3110_v30 }
0x1769   :  { %1197 = vmatprep.subr.bf16.mxu1 %v3115_v31  ;;  %1282 = vmatprep.subr.bf16.mxu0 %v3118_v36 }
0x176a   :  { %1215 = vmatprep.mubr.bf16.mxu1 %v3265_v1  ;;  %1300 = vmatprep.mubr.bf16.mxu0 %v3265_v1 }
0x176c   :  { %1198 = vmatpush1.bf16.msra.mxu1 %v3113_v37  ;;  %1283 = vmatpush1.bf16.msra.mxu0 %v3116_v40 }
0x176f   :  { %2802 = vmatmul.mubr.msk.bf16.vlgmr.msra.gmra.mxu1 %vm239_vm3, %v1154_v43  ;;  %2808 = vmatmul.mubr.msk.bf16.vlgmr.msra.gmra.mxu0 %vm239_vm3, %v1239_v41 }
0x1770   :  { %1225 = vmatprep.mubr.bf16.mxu1 %v3265_v1  ;;  %1310 = vmatprep.mubr.bf16.mxu0 %v3265_v1 }
0x1777   :  { %2803 = vmatmul.mubr.msk.bf16.gmra.mxu1 %vm239_vm3, %v1156_v42  ;;  %2809 = vmatmul.mubr.msk.bf16.gmra.mxu0 %vm239_vm3, %v1241_v44 }
0x1778   :  { %1454 = vmatprep.mubr.bf16.mxu1 %v3265_v1  ;;  %1532 = vmatprep.mubr.bf16.mxu0 %v3265_v1 }
0x1827   :  { %v3673_v32 = vpop.f32.mrf.mxu1  ;;  %v3675_v20 = vpop.f32.mrf.mxu0 }
0x1829   :  { %v2958_v9 = vpop.f32.mrf.mxu1  ;;  %v2969_v45 = vpop.f32.mrf.mxu0 }
0x182f   :  { %v1217_v53 = vpop.f32.mrf.mxu1  ;;  %v1302_v47 = vpop.f32.mrf.mxu0 }
0x1830   :  { %v1303_v58 = vadd.f32 %v1302_v47, %v1217_v53  ;;  %v3707_v47 = vld [vmem:[%s4075_s5 + $0x14] ss:$8 sps:$4 sm:$0xff]  }
0x1831   :  { %v1219_v55 = vpop.f32.mrf.mxu1  ;;  %v1304_v49 = vpop.f32.mrf.mxu0  ;;  %1434 = vmatprep.subr.bf16.mxu1 %v3707_v47  ;;  %1512 = vmatprep.subr.bf16.mxu0 %v3707_v47 }
0x1832   :  { %v1305_v50 = vadd.f32 %v1304_v49, %v1219_v55  ;;  %v1333_v15 = vadd.f32 %v1326_v33, %v1303_v58  ;;  %1435 = vmatpush1.bf16.msra.mxu1 %v3712_v48  ;;  %v3725_v49 = vld [vmem:[%s4075_s5] ss:$8 sps:$4 sm:$0xff]   ;;  %1513 = vmatpush1.bf16.msra.mxu0 %v3712_v48 }
0x1833   :  { %v1221_v51 = vpop.f32.mrf.mxu1  ;;  %v1306_v56 = vpop.f32.mrf.mxu0 }
0x1834   :  { %v1334_v57 = vadd.f32 %v1330_v54, %v1305_v50  ;;  %v1307_v59 = vadd.f32 %v1306_v56, %v1221_v51  ;;  %v1347_v26 = vrot.slane %v1333_v15, 4 }
0x1835   :  { %v1223_v60 = vpop.f32.mrf.mxu1  ;;  %v1308_v61 = vpop.f32.mrf.mxu0 }
0x1836   :  { %v1335_v34 = vadd.f32 %v1326_v33, %v1307_v59  ;;  %v1309_v62 = vadd.f32 %v1308_v61, %v1223_v60  ;;  %v1374_v24 = vrot.slane %v1334_v57, 4 }
0x1837   :  { %v1227_v63 = vpop.f32.mrf.mxu1  ;;  %v1312_v0 = vpop.f32.mrf.mxu0 }
0x1838   :  { %v1336_v52 = vadd.f32 %v1330_v54, %v1309_v62  ;;  %v1313_v2 = vadd.f32 %v1312_v0, %v1227_v63  ;;  %v1355_v16 = vrot.slane %v1335_v34, 4 }
0x1839   :  { %v1229_v46 = vpop.f32.mrf.mxu1  ;;  %v1314_v8 = vpop.f32.mrf.mxu0 }
0x183a   :  { %v1337_v3 = vadd.f32 %v1326_v33, %v1313_v2  ;;  %v1315_v4 = vadd.f32 %v1314_v8, %v1229_v46  ;;  %v1366_v39 = vrot.slane %v1336_v52, 4 }
0x183b   :  { %v1231_v5 = vpop.f32.mrf.mxu1  ;;  %v1316_v38 = vpop.f32.mrf.mxu0 }
0x183c   :  { %v1363_v6 = vrot.slane %v1337_v3, 4  ;;  %v1338_v11 = vadd.f32 %v1330_v54, %v1315_v4  ;;  %v1317_v13 = vadd.f32 %v1316_v38, %v1231_v5  ;;  %v3684_v14 = vsel %vm164_vm2, %v1337_v3, %v1336_v52 }
0x183d   :  { %v1233_v17 = vpop.f32.mrf.mxu1  ;;  %v1318_v18 = vpop.f32.mrf.mxu0 }
0x183e   :  { %v1358_v19 = vrot.slane %v1338_v11, 4  ;;  %v1339_v21 = vadd.f32 %v1326_v33, %v1317_v13  ;;  %v1319_v22 = vadd.f32 %v1318_v18, %v1233_v17  ;;  %v3687_v23 = vsel %vm164_vm2, %v1335_v34, %v1338_v11 }
0x183f   :  { %v3690_v25 = vsel %vm164_vm2, %v1363_v6, %v1366_v39 }
0x1840   :  { %v1371_v27 = vrot.slane %v1339_v21, 4  ;;  %v1340_v28 = vadd.f32 %v1330_v54, %v1319_v22  ;;  %v3693_v29 = vsel %vm164_vm2, %v1355_v16, %v1358_v19  ;;  %v3696_v30 = vsel %vm164_vm2, %v1339_v21, %v1334_v57  ;;  %v3718_v54 = vld [vmem:[%s4075_s5 + $0x4] ss:$8 sps:$4 sm:$0xff]  }
0x1841   :  { %1436 = vmatprep.subr.bf16.mxu1 %v3718_v54  ;;  %1514 = vmatprep.subr.bf16.mxu0 %v3718_v54 }
0x1842   :  { %v1345_v31 = vsel %vm164_vm2, %v1333_v15, %v1340_v28  ;;  %v1350_v36 = vrot.slane %v1340_v28, 4  ;;  %v3700_v37 = vsel %vm164_vm2, %v1371_v27, %v1374_v24  ;;  %1437 = vmatpush1.bf16.msra.mxu1 %v3725_v49  ;;  %1515 = vmatpush1.bf16.msra.mxu0 %v3725_v49 }
0x1843   :  { %3193 = vtanh.f32 %v1345_v31  ;;  %v2810_v41 = vmul.f32 -1.442695, %v1345_v31  ;;  %1586 = vmatprep.subr.bf16.mxu1 %v3707_v47  ;;  %1660 = vmatprep.subr.bf16.mxu0 %v3707_v47 }
0x1844   :  { %v1352_v40 = vsel %vm164_vm2, %v1347_v26, %v1350_v36 }
0x1845   :  { %3195 = vpow2.f32 %v2810_v41 }
0x1850   :  { %v3194_v43 = vpop.eup %3193 }
0x1851   :  { %1385 = vrot.lane.b32.xlu0 %v3194_v43, %s3266_s0 }
0x1852   :  { %v3196_v42 = vpop.eup %3195 }
0x1853   :  { %v1380_v44 = vadd.f32 1.0, %v3196_v42 }
0x1855   :  { %3197 = vrcp.f32 %v1380_v44 }
0x1862   :  { %v3198_v9 = vpop.eup %3197 }
0x18c3   :  { %v1386_v45 = vpop.permute.xlu0 %1385 }
0x18c4   :  { %v1388_v53 = vmul.f32 %v3198_v9, %v1386_v45 }
0x18c6   :  { %3199 = vtanh.f32 %v1388_v53 }
0x18d3   :  { %v3200_v55 = vpop.eup %3199 }
0x18d4   :  { %1391 = vrot.lane.b32.xlu1 %v3200_v55, %s3267_s22 }
0x1946   :  { %v1392_v50 = vpop.permute.xlu1 %1391 }
0x1947   :  { %v3735_v51 = vmul.f32 %v3198_v9, %v1392_v50 }
0x1949   :  { %v1395_v56 = vpack.c.bf16 %v3735_v51, %v3735_v51 }
0x194b   :  { %1397 = vrot.lane.b32.xlu0 %v1395_v56, %s3267_s22 }
0x194f   :  { %1473 = vrot.lane.b32.xlu0 %v1388_v53, %s3266_s0 }
0x19bd   :  { %v1398_v33 = vpop.permute.xlu0 %1397 }
0x19be   :  { %2815 = vmatmul.mubr.msk.bf16.vlgmr.msra.gmra.mxu1 %vm239_vm3, %v1398_v33 }
0x19bf   :  { %1587 = vmatpush1.bf16.msra.mxu1 %v3712_v48  ;;  %1606 = vmatprep.mubr.bf16.mxu1 %v3265_v1 }
0x19c0   :  { %1588 = vmatprep.subr.bf16.mxu1 %v3718_v54 }
0x19c1   :  { %v1474_v3 = vpop.permute.xlu0 %1473 }
0x19c3   :  { %1589 = vmatpush1.bf16.msra.mxu1 %v3725_v49 }
0x19c4   :  { %1734 = vmatprep.subr.bf16.mxu1 %v3707_v47 }
0x1a7e   :  { %v1456_v57 = vpop.f32.mrf.mxu1 }
0x1a80   :  { %v1458_v59 = vpop.f32.mrf.mxu1 }
0x1a81   :  { %v1463_v60 = vsel %vm56_vm4, %v1456_v57, %v1458_v59 }
0x1a82   :  { %v1464_v61 = vadd.f32 %v1463_v60, %v1352_v40  ;;  %v1460_v34 = vpop.f32.mrf.mxu1 }
0x1a84   :  { %3201 = vtanh.f32 %v1464_v61  ;;  %v1461_v62 = vpop.f32.mrf.mxu1  ;;  %v2816_v0 = vmul.f32 -1.442695, %v1464_v61 }
0x1a86   :  { %3203 = vpow2.f32 %v2816_v0 }
0x1a91   :  { %v3202_v63 = vpop.eup %3201 }
0x1a92   :  { %1478 = vrot.lane.b32.xlu1 %v3202_v63, %s3266_s0 }
0x1a93   :  { %v3204_v52 = vpop.eup %3203 }
0x1a94   :  { %v1468_v2 = vadd.f32 1.0, %v3204_v52 }
0x1a96   :  { %3205 = vrcp.f32 %v1468_v2 }
0x1aa3   :  { %v3206_v58 = vpop.eup %3205 }
0x1aa4   :  { %v1476_v4 = vmul.f32 %v3206_v58, %v1474_v3 }
0x1b04   :  { %v1479_v46 = vpop.permute.xlu1 %1478 }
0x1b05   :  { %v1481_v8 = vmul.f32 %v3206_v58, %v1479_v46 }
0x1b07   :  { %1483 = vrot.lane.b32.xlu1 %v1481_v8, %s3266_s0 }
0x1b79   :  { %v1484_v5 = vpop.permute.xlu1 %1483 }
0x1b7a   :  { %v1486_v38 = vadd.f32 %v1484_v5, %v1476_v4 }
0x1b7c   :  { %3207 = vtanh.f32 %v1486_v38 }
0x1b89   :  { %v3208_v6 = vpop.eup %3207 }
0x1b8a   :  { %1489 = vrot.lane.b32.xlu0 %v3208_v6, %s3266_s0 }
0x1bfc   :  { %v1490_v11 = vpop.permute.xlu0 %1489 }
0x1bfd   :  { %v3752_v13 = vmul.f32 %v3206_v58, %v1490_v11 }
0x1bff   :  { %v1493_v15 = vpack.c.bf16 %v3752_v13, %v3752_v13 }
0x1c01   :  { %1495 = vrot.lane.b32.xlu1 %v1493_v15, %s3267_s22 }
0x1c73   :  { %v1496_v16 = vpop.permute.xlu1 %1495 }
0x1c74   :  { %2817 = vmatmul.mubr.msk.bf16.vlgmr.msra.gmra.mxu0 %vm239_vm3, %v1496_v16 }
0x1c75   :  { %1661 = vmatpush1.bf16.msra.mxu0 %v3712_v48  ;;  %1680 = vmatprep.mubr.bf16.mxu0 %v3265_v1 }
0x1c76   :  { %1662 = vmatprep.subr.bf16.mxu0 %v3718_v54 }
0x1c79   :  { %1663 = vmatpush1.bf16.msra.mxu0 %v3725_v49 }
0x1c7a   :  { %1808 = vmatprep.subr.bf16.mxu0 %v3707_v47 }
0x1d34   :  { %v1534_v39 = vpop.f32.mrf.mxu0 }
0x1d36   :  { %v1536_v17 = vpop.f32.mrf.mxu0 }
0x1d37   :  { %v1541_v18 = vsel %vm56_vm4, %v1534_v39, %v1536_v17 }
0x1d38   :  { %v1542_v19 = vadd.f32 %v1541_v18, %v3687_v23  ;;  %v1538_v21 = vpop.f32.mrf.mxu0 }
0x1d3a   :  { %3209 = vtanh.f32 %v1542_v19  ;;  %v1539_v22 = vpop.f32.mrf.mxu0  ;;  %v2818_v27 = vmul.f32 -1.442695, %v1542_v19 }
0x1d3c   :  { %3211 = vpow2.f32 %v2818_v27 }
0x1d47   :  { %v3210_v24 = vpop.eup %3209 }
0x1d48   :  { %1552 = vrot.lane.b32.xlu0 %v3210_v24, %s3266_s0 }
0x1d49   :  { %v3212_v28 = vpop.eup %3211 }
0x1d4a   :  { %v1546_v26 = vadd.f32 1.0, %v3212_v28 }
0x1d4c   :  { %3213 = vrcp.f32 %v1546_v26 }
0x1d59   :  { %v3214_v31 = vpop.eup %3213 }
0x1d5a   :  { %v1550_v43 = vmul.f32 %v3214_v31, %v1486_v38 }
0x1dba   :  { %v1553_v36 = vpop.permute.xlu0 %1552 }
0x1dbb   :  { %v1555_v40 = vmul.f32 %v3214_v31, %v1553_v36 }
0x1dbd   :  { %1557 = vrot.lane.b32.xlu1 %v1555_v40, %s3266_s0 }
0x1e2f   :  { %v1558_v41 = vpop.permute.xlu1 %1557 }
0x1e30   :  { %v1560_v42 = vadd.f32 %v1558_v41, %v1550_v43 }
0x1e32   :  { %3215 = vtanh.f32 %v1560_v42 }
0x1e3f   :  { %v3216_v23 = vpop.eup %3215 }
0x1e40   :  { %1563 = vrot.lane.b32.xlu0 %v3216_v23, %s3266_s0 }
0x1eb2   :  { %v1564_v44 = vpop.permute.xlu0 %1563 }
0x1eb3   :  { %v3769_v9 = vmul.f32 %v3214_v31, %v1564_v44 }
0x1eb5   :  { %v1567_v45 = vpack.c.bf16 %v3769_v9, %v3769_v9 }
0x1eb7   :  { %1569 = vrot.lane.b32.xlu1 %v1567_v45, %s3267_s22 }
0x1f29   :  { %v1570_v53 = vpop.permute.xlu1 %1569 }
0x1f2a   :  { %2819 = vmatmul.mubr.msk.bf16.vlgmr.msra.gmra.mxu1 %vm239_vm3, %v1570_v53 }
0x1f2b   :  { %1735 = vmatpush1.bf16.msra.mxu1 %v3712_v48  ;;  %1754 = vmatprep.mubr.bf16.mxu1 %v3265_v1 }
0x1f2c   :  { %1736 = vmatprep.subr.bf16.mxu1 %v3718_v54 }
0x1f2f   :  { %1737 = vmatpush1.bf16.msra.mxu1 %v3725_v49 }
0x1f30   :  { %1882 = vmatprep.subr.bf16.mxu1 %v3707_v47 }
0x1fea   :  { %v1608_v55 = vpop.f32.mrf.mxu1 }
0x1fec   :  { %v1610_v50 = vpop.f32.mrf.mxu1 }
0x1fed   :  { %v1615_v56 = vsel %vm56_vm4, %v1608_v55, %v1610_v50 }
0x1fee   :  { %v1616_v33 = vadd.f32 %v1615_v56, %v3693_v29  ;;  %v1612_v57 = vpop.f32.mrf.mxu1 }
0x1ff0   :  { %3217 = vtanh.f32 %v1616_v33  ;;  %v1613_v59 = vpop.f32.mrf.mxu1  ;;  %v2820_v61 = vmul.f32 -1.442695, %v1616_v33 }
0x1ff2   :  { %3219 = vpow2.f32 %v2820_v61 }
0x1ffd   :  { %v3218_v60 = vpop.eup %3217 }
0x1ffe   :  { %1626 = vrot.lane.b32.xlu0 %v3218_v60, %s3266_s0 }
0x1fff   :  { %v3220_v34 = vpop.eup %3219 }
0x2000   :  { %v1620_v62 = vadd.f32 1.0, %v3220_v34 }
0x2002   :  { %3221 = vrcp.f32 %v1620_v62 }
0x200f   :  { %v3222_v63 = vpop.eup %3221 }
0x2010   :  { %v1624_v52 = vmul.f32 %v3222_v63, %v1560_v42 }
0x2070   :  { %v1627_v47 = vpop.permute.xlu0 %1626 }
0x2071   :  { %v1629_v0 = vmul.f32 %v3222_v63, %v1627_v47 }
0x2073   :  { %1631 = vrot.lane.b32.xlu1 %v1629_v0, %s3266_s0 }
0x20e5   :  { %v1632_v2 = vpop.permute.xlu1 %1631 }
0x20e6   :  { %v1634_v58 = vadd.f32 %v1632_v2, %v1624_v52 }
0x20e8   :  { %3223 = vtanh.f32 %v1634_v58 }
0x20f5   :  { %v3224_v29 = vpop.eup %3223 }
0x20f6   :  { %1637 = vrot.lane.b32.xlu0 %v3224_v29, %s3266_s0 }
0x2168   :  { %v1638_v46 = vpop.permute.xlu0 %1637 }
0x2169   :  { %v3786_v8 = vmul.f32 %v3222_v63, %v1638_v46 }
0x216b   :  { %v1641_v3 = vpack.c.bf16 %v3786_v8, %v3786_v8  ;;  %v1941_v7 = vrot.slane %v3786_v8, 4 }
0x216d   :  { %1643 = vrot.lane.b32.xlu1 %v1641_v3, %s3267_s22 }
0x21df   :  { %v1644_v4 = vpop.permute.xlu1 %1643 }
0x21e0   :  { %2821 = vmatmul.mubr.msk.bf16.vlgmr.msra.gmra.mxu0 %vm239_vm3, %v1644_v4 }
0x21e1   :  { %1809 = vmatpush1.bf16.msra.mxu0 %v3712_v48  ;;  %1828 = vmatprep.mubr.bf16.mxu0 %v3265_v1 }
0x21e2   :  { %1810 = vmatprep.subr.bf16.mxu0 %v3718_v54 }
0x21e5   :  { %1811 = vmatpush1.bf16.msra.mxu0 %v3725_v49 }
0x21e6   :  { %2970 = vmatprep.subr.mxu0 %v3268_v35 }
0x22a0   :  { %v1682_v5 = vpop.f32.mrf.mxu0 }
0x22a2   :  { %v1684_v38 = vpop.f32.mrf.mxu0 }
0x22a3   :  { %v1689_v6 = vsel %vm56_vm4, %v1682_v5, %v1684_v38 }
0x22a4   :  { %v1690_v11 = vadd.f32 %v1689_v6, %v3684_v14  ;;  %v1686_v15 = vpop.f32.mrf.mxu0 }
0x22a6   :  { %3225 = vtanh.f32 %v1690_v11  ;;  %v1687_v16 = vpop.f32.mrf.mxu0  ;;  %v2822_v17 = vmul.f32 -1.442695, %v1690_v11 }
0x22a8   :  { %3227 = vpow2.f32 %v2822_v17 }
0x22b3   :  { %v3226_v39 = vpop.eup %3225 }
0x22b4   :  { %1700 = vrot.lane.b32.xlu0 %v3226_v39, %s3266_s0 }
0x22b5   :  { %v3228_v18 = vpop.eup %3227 }
0x22b6   :  { %v1694_v19 = vadd.f32 1.0, %v3228_v18 }
0x22b8   :  { %3229 = vrcp.f32 %v1694_v19 }
0x22c5   :  { %v3230_v21 = vpop.eup %3229 }
0x22c6   :  { %v1698_v27 = vmul.f32 %v3230_v21, %v1634_v58 }
0x2326   :  { %v1701_v22 = vpop.permute.xlu0 %1700 }
0x2327   :  { %v1703_v24 = vmul.f32 %v3230_v21, %v1701_v22 }
0x2329   :  { %1705 = vrot.lane.b32.xlu1 %v1703_v24, %s3266_s0 }
0x239b   :  { %v1706_v28 = vpop.permute.xlu1 %1705 }
0x239c   :  { %v1708_v26 = vadd.f32 %v1706_v28, %v1698_v27 }
0x239e   :  { %3231 = vtanh.f32 %v1708_v26 }
0x23ab   :  { %v3232_v14 = vpop.eup %3231 }
0x23ac   :  { %1711 = vrot.lane.b32.xlu0 %v3232_v14, %s3266_s0 }
0x241e   :  { %v1712_v31 = vpop.permute.xlu0 %1711 }
0x241f   :  { %v3803_v36 = vmul.f32 %v3230_v21, %v1712_v31 }
0x2421   :  { %v1715_v40 = vpack.c.bf16 %v3803_v36, %v3803_v36 }
0x2423   :  { %1717 = vrot.lane.b32.xlu1 %v1715_v40, %s3267_s22 }
0x2495   :  { %v1718_v43 = vpop.permute.xlu1 %1717 }
0x2496   :  { %2823 = vmatmul.mubr.msk.bf16.vlgmr.msra.gmra.mxu1 %vm239_vm3, %v1718_v43 }
0x2497   :  { %1883 = vmatpush1.bf16.msra.mxu1 %v3712_v48  ;;  %1902 = vmatprep.mubr.bf16.mxu1 %v3265_v1 }
0x2498   :  { %1884 = vmatprep.subr.bf16.mxu1 %v3718_v54 }
0x249b   :  { %1885 = vmatpush1.bf16.msra.mxu1 %v3725_v49 }
0x249c   :  { %2981 = vmatprep.subr.mxu1 %v3268_v35 }
0x2556   :  { %v1756_v41 = vpop.f32.mrf.mxu1 }
0x2558   :  { %v1758_v42 = vpop.f32.mrf.mxu1 }
0x2559   :  { %v1763_v23 = vsel %vm56_vm4, %v1756_v41, %v1758_v42 }
0x255a   :  { %v1764_v44 = vadd.f32 %v1763_v23, %v3690_v25  ;;  %v1760_v45 = vpop.f32.mrf.mxu1 }
0x255c   :  { %3233 = vtanh.f32 %v1764_v44  ;;  %v1761_v53 = vpop.f32.mrf.mxu1  ;;  %v2824_v1 = vmul.f32 -1.442695, %v1764_v44  ;;  %v1938_v44 = vrot.slane %v3752_v13, 4 }
0x255d   :  { %v1955_v53 = vsel %vm164_vm2, %v1941_v7, %v3769_v9 }
0x255e   :  { %3235 = vpow2.f32 %v2824_v1 }
0x2569   :  { %v3234_v55 = vpop.eup %3233 }
0x256a   :  { %1774 = vrot.lane.b32.xlu0 %v3234_v55, %s3266_s0 }
0x256b   :  { %v3236_v48 = vpop.eup %3235 }
0x256c   :  { %v1768_v54 = vadd.f32 1.0, %v3236_v48 }
0x256e   :  { %3237 = vrcp.f32 %v1768_v54 }
0x257b   :  { %v3238_v49 = vpop.eup %3237 }
0x257c   :  { %v1772_v33 = vmul.f32 %v3238_v49, %v1708_v26 }
0x25dc   :  { %v1775_v50 = vpop.permute.xlu0 %1774 }
0x25dd   :  { %v1777_v56 = vmul.f32 %v3238_v49, %v1775_v50 }
0x25df   :  { %1779 = vrot.lane.b32.xlu1 %v1777_v56, %s3266_s0 }
0x2651   :  { %v1780_v57 = vpop.permute.xlu1 %1779 }
0x2652   :  { %v1782_v59 = vadd.f32 %v1780_v57, %v1772_v33 }
0x2654   :  { %3239 = vtanh.f32 %v1782_v59 }
0x2661   :  { %v3240_v25 = vpop.eup %3239 }
0x2662   :  { %1785 = vrot.lane.b32.xlu0 %v3240_v25, %s3266_s0 }
0x26d4   :  { %v1786_v60 = vpop.permute.xlu0 %1785 }
0x26d5   :  { %v3820_v61 = vmul.f32 %v3238_v49, %v1786_v60 }
0x26d7   :  { %v1789_v34 = vpack.c.bf16 %v3820_v61, %v3820_v61  ;;  %v1944_v45 = vrot.slane %v3820_v61, 4 }
0x26d9   :  { %1791 = vrot.lane.b32.xlu1 %v1789_v34, %s3267_s22  ;;  %v1954_v55 = vsel %vm164_vm2, %v1944_v45, %v3803_v36  ;;  %v1951_v34 = vsel %vm164_vm2, %v3803_v36, %v1944_v45 }
0x274b   :  { %v1792_v62 = vpop.permute.xlu1 %1791 }
0x274c   :  { %2825 = vmatmul.mubr.msk.bf16.vlgmr.msra.gmra.mxu0 %vm239_vm3, %v1792_v62  ;;  %v1950_v62 = vsel %vm164_vm2, %v3769_v9, %v1941_v7 }
0x274d   :  { %2978 = vmatprep.mubr.msk.f32.mxu0 %vm3269_vm5, %v3268_v35 }
0x280c   :  { %v1830_v63 = vpop.f32.mrf.mxu0 }
0x280e   :  { %v1832_v47 = vpop.f32.mrf.mxu0 }
0x280f   :  { %v1837_v0 = vsel %vm56_vm4, %v1830_v63, %v1832_v47  ;;  %v1949_v63 = vsel %vm164_vm2, %v3735_v51, %v1938_v44 }
0x2810   :  { %v1838_v52 = vadd.f32 %v1837_v0, %v3696_v30  ;;  %v1834_v2 = vpop.f32.mrf.mxu0 }
0x2812   :  { %3241 = vtanh.f32 %v1838_v52  ;;  %v1835_v58 = vpop.f32.mrf.mxu0  ;;  %v2826_v46 = vmul.f32 -1.442695, %v1838_v52 }
0x2814   :  { %3243 = vpow2.f32 %v2826_v46 }
0x281f   :  { %v3242_v29 = vpop.eup %3241 }
0x2820   :  { %1848 = vrot.lane.b32.xlu0 %v3242_v29, %s3266_s0 }
0x2821   :  { %v3244_v3 = vpop.eup %3243 }
0x2822   :  { %v1842_v4 = vadd.f32 1.0, %v3244_v3 }
0x2824   :  { %3245 = vrcp.f32 %v1842_v4 }
0x2831   :  { %v3246_v5 = vpop.eup %3245 }
0x2832   :  { %v1846_v11 = vmul.f32 %v3246_v5, %v1782_v59  ;;  %v1957_v59 = vld [vmem:[%s4076_s8] sm:$0x1] }
0x2833   :  { %v1962_v61 = vrot.slane %v1957_v59, %v3376_v10 }
0x2892   :  { %v1849_v38 = vpop.permute.xlu0 %1848 }
0x2893   :  { %v1851_v6 = vmul.f32 %v3246_v5, %v1849_v38 }
0x2895   :  { %1853 = vrot.lane.b32.xlu1 %v1851_v6, %s3266_s0 }
0x2907   :  { %v1854_v15 = vpop.permute.xlu1 %1853 }
0x2908   :  { %v1856_v16 = vadd.f32 %v1854_v15, %v1846_v11 }
0x290a   :  { %3247 = vtanh.f32 %v1856_v16 }
0x2917   :  { %v3248_v30 = vpop.eup %3247 }
0x2918   :  { %1859 = vrot.lane.b32.xlu0 %v3248_v30, %s3266_s0 }
0x298a   :  { %v1860_v39 = vpop.permute.xlu0 %1859 }
0x298b   :  { %v1862_v17 = vmul.f32 %v3246_v5, %v1860_v39 }
0x298d   :  { %v1863_v18 = vpack.c.bf16 %v1862_v17, %v1862_v17 }
0x298f   :  { %1865 = vrot.lane.b32.xlu1 %v1863_v18, %s3267_s22 }
0x2a01   :  { %v1866_v19 = vpop.permute.xlu1 %1865 }
0x2a02   :  { %2827 = vmatmul.mubr.msk.bf16.vlgmr.msra.gmra.mxu1 %vm239_vm3, %v1866_v19 }
0x2a03   :  { %2989 = vmatprep.mubr.msk.f32.mxu1 %vm3269_vm5, %v3268_v35 }
0x2ac2   :  { %v1904_v21 = vpop.f32.mrf.mxu1 }
0x2ac4   :  { %v1906_v22 = vpop.f32.mrf.mxu1 }
0x2ac5   :  { %v1911_v24 = vsel %vm56_vm4, %v1904_v21, %v1906_v22  ;;  %v2323_v21 = vld [vmem:[%s4077_s10 + $0x30] sm:$0xff] }
0x2ac6   :  { %v1912_v27 = vadd.f32 %v1911_v24, %v3700_v37  ;;  %v1908_v28 = vpop.f32.mrf.mxu1  ;;  %v1956_v37 = vsel %vm164_vm2, %v1938_v44, %v3735_v51  ;;  %v2319_v22 = vld [vmem:[%s4077_s10 + $0x10] sm:$0xff]  ;;  %v2322_v24 = vld [vmem:[%s4077_s10 + $0x28] sm:$0xff] }
0x2ac7   :  { %v2321_v28 = vld [vmem:[%s4077_s10 + $0x20] sm:$0xff] }
0x2ac8   :  { %3249 = vtanh.f32 %v1912_v27  ;;  %v1909_v26 = vpop.f32.mrf.mxu1  ;;  %v2828_v31 = vmul.f32 -1.442695, %v1912_v27  ;;  %v2318_v27 = vld [vmem:[%s4077_s10 + $0x8] sm:$0xff] }
0x2ac9   :  { %v2317_v26 = vld [vmem:[%s4077_s10] sm:$0xff] }
0x2aca   :  { %3251 = vpow2.f32 %v2828_v31  ;;  %v2332_v31 = vld [vmem:[%s4077_s10 + $0x78] sm:$0xff] }
0x2ad5   :  { %v3250_v14 = vpop.eup %3249 }
0x2ad6   :  { %1922 = vrot.lane.b32.xlu0 %v3250_v14, %s3266_s0  ;;  %v2328_v14 = vld [vmem:[%s4077_s10 + $0x58] sm:$0xff] }
0x2ad7   :  { %v3252_v40 = vpop.eup %3251 }
0x2ad8   :  { %v1916_v43 = vadd.f32 1.0, %v3252_v40  ;;  %v2327_v40 = vld [vmem:[%s4077_s10 + $0x50] sm:$0xff] }
0x2ada   :  { %3253 = vrcp.f32 %v1916_v43  ;;  %v2331_v43 = vld [vmem:[%s4077_s10 + $0x70] sm:$0xff] }
0x2ae7   :  { %v3254_v41 = vpop.eup %3253 }
0x2ae8   :  { %v1920_v13 = vmul.f32 %v3254_v41, %v1856_v16 }
0x2b48   :  { %v1923_v42 = vpop.permute.xlu0 %1922 }
0x2b49   :  { %v1925_v23 = vmul.f32 %v3254_v41, %v1923_v42  ;;  %v2329_v42 = vld [vmem:[%s4077_s10 + $0x60] sm:$0xff] }
0x2b4b   :  { %1927 = vrot.lane.b32.xlu1 %v1925_v23, %s3266_s0  ;;  %v2667_v23 = vld [vmem:[%s4078_s14 + $0x78] sm:$0xff] }
0x2b4f   :  { %1975 = vrot.lane.b32.xlu1 %v1956_v37, %s3267_s22  ;;  %v2666_v37 = vld [vmem:[%s4078_s14 + $0x70] sm:$0xff] }
0x2b53   :  { %1973 = vrot.lane.b32.xlu1 %v1955_v53, %s3267_s22 }
0x2b57   :  { %1971 = vrot.lane.b32.xlu1 %v1954_v55, %s3267_s22  ;;  %v2665_v55 = vld [vmem:[%s4078_s14 + $0x68] sm:$0xff] }
0x2bbd   :  { %v1928_v1 = vpop.permute.xlu1 %1927 }
0x2bbe   :  { %v1930_v8 = vadd.f32 %v1928_v1, %v1920_v13  ;;  %v2664_v13 = vld [vmem:[%s4078_s14 + $0x60] sm:$0xff]  ;;  %v2663_v1 = vld [vmem:[%s4078_s14 + $0x58] sm:$0xff] }
0x2bc0   :  { %3255 = vtanh.f32 %v1930_v8 }
0x2bc1   :  { %v1976_v48 = vpop.permute.xlu1 %1975 }
0x2bc2   :  { %2971 = vmatpush3.xpose.msk.msra.mxu0 %vm239_vm3, %v1976_v48 }
0x2bc3   :  { %2972 = vmatprep.subr.mxu0 %v3268_v35 }
0x2bc5   :  { %v1974_v54 = vpop.permute.xlu1 %1973 }
0x2bc6   :  { %2973 = vmatpush3.xpose.msk.msra.mxu0 %vm239_vm3, %v1974_v54 }
0x2bc7   :  { %2974 = vmatprep.subr.mxu0 %v3268_v35 }
0x2bc9   :  { %v1972_v49 = vpop.permute.xlu1 %1971 }
0x2bca   :  { %2975 = vmatpush3.xpose.msk.msra.mxu0 %vm239_vm3, %v1972_v49 }
0x2bcb   :  { %2976 = vmatprep.subr.mxu0 %v3268_v35 }
0x2bcd   :  { %v3256_v50 = vpop.eup %3255 }
0x2bce   :  { %1933 = vrot.lane.b32.xlu0 %v3256_v50, %s3266_s0 }
0x2c40   :  { %v1934_v56 = vpop.permute.xlu0 %1933 }
0x2c41   :  { %v1936_v33 = vmul.f32 %v3254_v41, %v1934_v56  ;;  %v2325_v41 = vld [vmem:[%s4077_s10 + $0x40] sm:$0xff] }
0x2c43   :  { %v1947_v57 = vrot.slane %v1936_v33, 4  ;;  %v2661_v33 = vld [vmem:[%s4078_s14 + $0x48] sm:$0xff] }
0x2c45   :  { %v1953_v25 = vsel %vm164_vm2, %v1947_v57, %v1862_v17  ;;  %v1952_v60 = vsel %vm164_vm2, %v1862_v17, %v1947_v57  ;;  %v2660_v57 = vld [vmem:[%s4078_s14 + $0x40] sm:$0xff] }
0x2c46   :  { %1969 = vrot.lane.b32.xlu1 %v1953_v25, %s3267_s22  ;;  %2067 = vrot.lane.b32.xlu0 %v1952_v60, %s3267_s22  ;;  %v2658_v25 = vld [vmem:[%s4078_s14 + $0x30] sm:$0xff]  ;;  %v2657_v60 = vld [vmem:[%s4078_s14 + $0x28] sm:$0xff] }
0x2c4a   :  { %1963 = vrot.lane.b32.xlu1 %v1962_v61, %s3270_s7  ;;  %2065 = vrot.lane.b32.xlu0 %v1951_v34, %s3267_s22  ;;  %v2656_v61 = vld [vmem:[%s4078_s14 + $0x20] sm:$0xff]  ;;  %v2655_v34 = vld [vmem:[%s4078_s14 + $0x18] sm:$0xff] }
0x2c4e   :  { %2063 = vrot.lane.b32.xlu0 %v1950_v62, %s3267_s22  ;;  %v2654_v62 = vld [vmem:[%s4078_s14 + $0x10] sm:$0xff] }
0x2c52   :  { %2061 = vrot.lane.b32.xlu0 %v1949_v63, %s3267_s22  ;;  %v2653_v63 = vld [vmem:[%s4078_s14 + $0x8] sm:$0xff] }
0x2cb8   :  { %v1970_v47 = vpop.permute.xlu1 %1969  ;;  %v2068_v0 = vpop.permute.xlu0 %2067 }
0x2cb9   :  { %2977 = vmatpush3.xpose.msk.msra.mxu0 %vm239_vm3, %v1970_v47  ;;  %2982 = vmatpush3.xpose.msk.msra.mxu1 %vm239_vm3, %v2068_v0 }
0x2cba   :  { %2992 = vmatprep.subr.mxu0 %v3268_v35  ;;  %2983 = vmatprep.subr.mxu1 %v3268_v35 }
0x2cbc   :  { %v1964_v36 = vpop.permute.xlu1 %1963  ;;  %v2066_v52 = vpop.permute.xlu0 %2065 }
0x2cbd   :  { %2979 = vmatmul.mubr.msk.f32.vlgmr.msra.gmra.mxu0 %vm239_vm3, %v1964_v36  ;;  %2984 = vmatpush3.xpose.msk.msra.mxu1 %vm239_vm3, %v2066_v52 }
0x2cbe   :  { %2993 = vmatpush3.msra.mxu0 %v2068_v0  ;;  %2985 = vmatprep.subr.mxu1 %v3268_v35 }
0x2cbf   :  { %2994 = vmatprep.subr.mxu0 %v3268_v35  ;;  %3000 = vmatprep.mubr.msk.f32.mxu0 %vm3269_vm5, %v3268_v35 }
0x2cc0   :  { %2995 = vmatpush3.msra.mxu0 %v2066_v52  ;;  %v2064_v51 = vpop.permute.xlu0 %2063 }
0x2cc1   :  { %2996 = vmatprep.subr.mxu0 %v3268_v35  ;;  %2986 = vmatpush3.xpose.msk.msra.mxu1 %vm239_vm3, %v2064_v51 }
0x2cc2   :  { %2997 = vmatpush3.msra.mxu0 %v2064_v51  ;;  %2987 = vmatprep.subr.mxu1 %v3268_v35  ;;  %v2845_v51 = vld [vmem:[%s4079_s11] ss:$0 sm:$0xff] }
0x2cc3   :  { %2998 = vmatprep.subr.mxu0 %v3268_v35 }
0x2cc4   :  { %v2062_v9 = vpop.permute.xlu0 %2061 }
0x2cc5   :  { %2988 = vmatpush3.xpose.msk.msra.mxu1 %vm239_vm3, %v2062_v9  ;;  %2999 = vmatpush3.msra.mxu0 %v2062_v9 }
0x2cc6   :  { %3003 = vmatprep.subr.mxu1 %v3268_v35  ;;  %3014 = vmatprep.subr.mxu0 %v3268_v35 }
0x2cc8   :  { %2990 = vmatmul.mubr.msk.f32.vlgmr.msra.gmra.mxu1 %vm239_vm3, %v1957_v59  ;;  %v2659_v59 = vld [vmem:[%s4078_s14 + $0x38] sm:$0xff] }
0x2cc9   :  { %3004 = vmatpush3.msra.mxu1 %v1976_v48  ;;  %3011 = vmatprep.mubr.msk.f32.mxu1 %vm3269_vm5, %v3268_v35 }
0x2cca   :  { %3005 = vmatprep.subr.mxu1 %v3268_v35 }
0x2ccb   :  { %3006 = vmatpush3.msra.mxu1 %v1974_v54  ;;  %v2662_v54 = vld [vmem:[%s4078_s14 + $0x50] sm:$0xff] }
0x2ccc   :  { %3007 = vmatprep.subr.mxu1 %v3268_v35 }
0x2ccd   :  { %3008 = vmatpush3.msra.mxu1 %v1972_v49 }
0x2cce   :  { %3009 = vmatprep.subr.mxu1 %v3268_v35 }
0x2ccf   :  { %3010 = vmatpush3.msra.mxu1 %v1970_v47  ;;  %v2652_v47 = vld [vmem:[%s4078_s14] sm:$0xff] }
0x2cd0   :  { %3025 = vmatprep.subr.mxu1 %v3268_v35 }
0x2d7d   :  { %v2053_v2 = vpop.f32.mrf.mxu0 }
0x2d7f   :  { %v2980_v58 = vpop.f32.mrf.mxu0 }
0x2d88   :  { %v2145_v29 = vpop.f32.mrf.mxu1 }
0x2d89   :  { %v2146_v46 = vadd.f32 %v2145_v29, %v2053_v2  ;;  %v2846_v29 = vld [vmem:[%s4080_s12] ss:$0 sm:$0xff] }
0x2d8a   :  { %v2991_v3 = vpop.f32.mrf.mxu1 }
0x2d8b   :  { %v2149_v4 = vmax.f32 %v2146_v46, 0.0 }
0x2d8d   :  { %v2153_v5 = vrot.slane %v2149_v4, %v3376_v10  ;;  %v2324_v10 = vld [vmem:[%s4077_s10 + $0x38] sm:$0xff] }
0x2d8f   :  { %v2154_v38 = vadd.f32 %v2153_v5, %v3621_v12  ;;  %v2320_v12 = vld [vmem:[%s4077_s10 + $0x18] sm:$0xff] }
0x2d91   :  { %v2155_v6 = vsel %vm239_vm3, %v2154_v38, -inf }
0x2d92   :  { %2156 = vmax.xlane.f32.xlu0 %v2155_v6 }
0x2e1b   :  { %v2157_v11 = vpop.xlane.xlu0 %2156 }
0x2e1c   :  { %v2158_v15 = vsub.f32 %v2154_v38, %v2157_v11  ;;  %v2848_v38 = vld [vmem:[%s4082_s15] ss:$0 sm:$0xff] }
0x2e1e   :  { %v2159_v16 = vmul.f32 1.442695, %v2158_v15 }
0x2e20   :  { %3257 = vpow2.f32 %v2159_v16 }
0x2e2d   :  { %v3258_v30 = vpop.eup %3257 }
0x2e2e   :  { %v2161_v39 = vsel %vm239_vm3, %v3258_v30, 0.0 }
0x2e2f   :  { %2162 = vadd.xlane.f32.xlu1 %v2161_v39 }
0x2eb8   :  { %v2163_v17 = vpop.xlane.xlu1 %2162 }
0x2eb9   :  { %3259 = vrcp.f32 %v2163_v17 }
0x2ec6   :  { %v3260_v18 = vpop.eup %3259 }
0x2ec7   :  { %v2165_v19 = vmul.f32 %v3260_v18, %v3258_v30 }
0x2ec9   :  { %3001 = vmatmul.mubr.msk.f32.vlgmr.msra.gmra.mxu0 %vm239_vm3, %v2165_v19  ;;  %3012 = vmatmul.mubr.msk.f32.vlgmr.msra.gmra.mxu1 %vm239_vm3, %v2165_v19 }
0x2eca   :  { %3015 = vmatpush3.msra.mxu0 %v2324_v10  ;;  %3026 = vmatpush3.msra.mxu1 %v2320_v12 }
0x2ecb   :  { %3016 = vmatprep.subr.mxu0 %v3268_v35  ;;  %3027 = vmatprep.subr.mxu1 %v3268_v35 }
0x2ecc   :  { %3017 = vmatpush3.msra.mxu0 %v2323_v21  ;;  %3028 = vmatpush3.msra.mxu1 %v2319_v22 }
0x2ecd   :  { %3018 = vmatprep.subr.mxu0 %v3268_v35  ;;  %3029 = vmatprep.subr.mxu1 %v3268_v35 }
0x2ece   :  { %3019 = vmatpush3.msra.mxu0 %v2322_v24  ;;  %3030 = vmatpush3.msra.mxu1 %v2318_v27 }
0x2ecf   :  { %3020 = vmatprep.subr.mxu0 %v3268_v35  ;;  %3031 = vmatprep.subr.mxu1 %v3268_v35 }
0x2ed0   :  { %3021 = vmatpush3.msra.mxu0 %v2321_v28  ;;  %3022 = vmatprep.mubr.msk.f32.mxu0 %vm3269_vm5, %v3268_v35 }
0x2ed1   :  { %3032 = vmatpush3.msra.mxu1 %v2317_v26  ;;  %3033 = vmatprep.mubr.msk.f32.mxu1 %vm3269_vm5, %v3268_v35 }
0x2ed2   :  { %3023 = vmatmul.mubr.msk.f32.vlgmr.msra.gmra.mxu0 %vm239_vm3, %v3675_v20  ;;  %3034 = vmatmul.mubr.msk.f32.vlgmr.msra.gmra.mxu1 %vm239_vm3, %v3673_v32  ;;  %v2326_v32 = vld [vmem:[%s4077_s10 + $0x48] sm:$0xff] }
0x2ed3   :  { %3036 = vmatprep.subr.mxu0 %v3268_v35  ;;  %3047 = vmatprep.subr.mxu1 %v3268_v35  ;;  %v2330_v20 = vld [vmem:[%s4077_s10 + $0x68] sm:$0xff] }
0x2ed4   :  { %3037 = vmatpush3.msra.mxu0 %v2328_v14  ;;  %3048 = vmatpush3.msra.mxu1 %v2332_v31 }
0x2ed5   :  { %3038 = vmatprep.subr.mxu0 %v3268_v35  ;;  %3049 = vmatprep.subr.mxu1 %v3268_v35 }
0x2ed6   :  { %3039 = vmatpush3.msra.mxu0 %v2327_v40  ;;  %3050 = vmatpush3.msra.mxu1 %v2331_v43 }
0x2ed7   :  { %3040 = vmatprep.subr.mxu0 %v3268_v35  ;;  %3051 = vmatprep.subr.mxu1 %v3268_v35 }
0x2ed8   :  { %3041 = vmatpush3.msra.mxu0 %v2326_v32  ;;  %3052 = vmatpush3.msra.mxu1 %v2330_v20 }
0x2ed9   :  { %3042 = vmatprep.subr.mxu0 %v3268_v35  ;;  %3053 = vmatprep.subr.mxu1 %v3268_v35 }
0x2eda   :  { %3044 = vmatprep.mubr.msk.f32.mxu0 %vm3269_vm5, %v3268_v35  ;;  %3055 = vmatprep.mubr.msk.f32.mxu1 %vm3269_vm5, %v3268_v35 }
0x2edb   :  { %3043 = vmatpush3.msra.mxu0 %v2325_v41  ;;  %3054 = vmatpush3.msra.mxu1 %v2329_v42 }
0x2edc   :  { %3058 = vmatprep.subr.mxu0 %v3268_v35 }
0x2f89   :  { %v2239_v44 = vpop.f32.mrf.mxu0  ;;  %v2313_v7 = vpop.f32.mrf.mxu1 }
0x2f8a   :  { %3045 = vmatmul.mubr.msk.f32.vlgmr.msra.gmra.mxu0 %vm239_vm3, %v2239_v44  ;;  %3056 = vmatmul.mubr.msk.f32.vlgmr.msra.gmra.mxu1 %vm239_vm3, %v2313_v7 }
0x2f8b   :  { %v3002_v45 = vpop.f32.mrf.mxu0  ;;  %v3013_v53 = vpop.f32.mrf.mxu1  ;;  %3059 = vmatpush3.msra.mxu0 %v2667_v23  ;;  %3090 = vmatprep.mubr.msk.f32.mxu0 %vm3269_vm5, %v3268_v35 }
0x2f8c   :  { %3060 = vmatprep.subr.mxu0 %v3268_v35 }
0x2f8d   :  { %3061 = vmatpush3.msra.mxu0 %v2666_v37 }
0x2f8e   :  { %3062 = vmatprep.subr.mxu0 %v3268_v35 }
0x2f8f   :  { %3063 = vmatpush3.msra.mxu0 %v2665_v55 }
0x2f90   :  { %3064 = vmatprep.subr.mxu0 %v3268_v35 }
0x2f91   :  { %3065 = vmatpush3.msra.mxu0 %v2664_v13 }
0x2f92   :  { %v2402_v8 = vpop.f32.mrf.mxu0  ;;  %v2475_v48 = vpop.f32.mrf.mxu1  ;;  %3066 = vmatprep.subr.mxu0 %v3268_v35 }
0x2f93   :  { %v2476_v49 = vadd.f32 %v2475_v48, %v2402_v8  ;;  %3067 = vmatpush3.msra.mxu0 %v2663_v1 }
0x2f94   :  { %v3024_v50 = vpop.f32.mrf.mxu0  ;;  %v3035_v56 = vpop.f32.mrf.mxu1  ;;  %3068 = vmatprep.subr.mxu0 %v3268_v35 }
0x2f95   :  { %3069 = vmatpush3.msra.mxu0 %v2662_v54 }
0x2f96   :  { %3070 = vmatprep.subr.mxu0 %v3268_v35 }
0x2f97   :  { %3071 = vmatpush3.msra.mxu0 %v2661_v33 }
0x2f98   :  { %3072 = vmatprep.subr.mxu0 %v3268_v35 }
0x2f99   :  { %3073 = vmatpush3.msra.mxu0 %v2660_v57 }
0x2f9a   :  { %3074 = vmatprep.subr.mxu0 %v3268_v35 }
0x2f9b   :  { %3075 = vmatpush3.msra.mxu0 %v2659_v59 }
0x2f9c   :  { %3076 = vmatprep.subr.mxu0 %v3268_v35 }
0x2f9d   :  { %3077 = vmatpush3.msra.mxu0 %v2658_v25 }
0x2f9e   :  { %3078 = vmatprep.subr.mxu0 %v3268_v35 }
0x2f9f   :  { %3079 = vmatpush3.msra.mxu0 %v2657_v60 }
0x2fa0   :  { %3080 = vmatprep.subr.mxu0 %v3268_v35 }
0x2fa1   :  { %3081 = vmatpush3.msra.mxu0 %v2656_v61 }
0x2fa2   :  { %3082 = vmatprep.subr.mxu0 %v3268_v35 }
0x2fa3   :  { %3083 = vmatpush3.msra.mxu0 %v2655_v34 }
0x2fa4   :  { %3084 = vmatprep.subr.mxu0 %v3268_v35 }
0x2fa5   :  { %3085 = vmatpush3.msra.mxu0 %v2654_v62 }
0x2fa6   :  { %3086 = vmatprep.subr.mxu0 %v3268_v35 }
0x2fa7   :  { %3087 = vmatpush3.msra.mxu0 %v2653_v63 }
0x2fa8   :  { %3088 = vmatprep.subr.mxu0 %v3268_v35  ;;  %v2847_v35 = vld [vmem:[%s4081_s13] ss:$0 sm:$0xff] }
0x2fa9   :  { %3089 = vmatpush3.msra.mxu0 %v2652_v47 }
0x304a   :  { %v2548_v0 = vpop.f32.mrf.mxu0  ;;  %v2622_v36 = vpop.f32.mrf.mxu1 }
0x304b   :  { %v2552_v52 = vadd.f32 %v2548_v0, %v2476_v49 }
0x304c   :  { %v3046_v9 = vpop.f32.mrf.mxu0  ;;  %v3057_v2 = vpop.f32.mrf.mxu1 }
0x304d   :  { %v2626_v58 = vadd.f32 %v2622_v36, %v2552_v52 }
0x304f   :  { %v2634_v46 = vadd.f32 %v2845_v51, %v2626_v58 }
0x3051   :  { %v2642_v3 = vmul.f32 %v2846_v29, %v2634_v46 }
0x3053   :  { %v2650_v4 = vadd.f32 %v2847_v35, %v2642_v3 }
0x3055   :  { %v2651_v5 = vmax.f32 %v2650_v4, 0.0 }
0x3057   :  { %3091 = vmatmul.mubr.f32.vlgmr.msra.gmra.mxu0 %v2651_v5 }
0x3117   :  { %v2741_v6 = vpop.f32.mrf.mxu0 }
0x3118   :  { %v2742_v11 = vadd.f32 %v2848_v38, %v2741_v6 }
0x3119   :  { %v3092_v15 = vpop.f32.mrf.mxu0 }
0x311a   :  { %2745 = vmax.xlane.f32.xlu0 %v2742_v11 }
0x31a3   :  { %v2746_v16 = vpop.xlane.xlu0 %2745 }
0x31a4   :  { %v2747_v30 = vsub.f32 %v2742_v11, %v2746_v16 }
0x31a6   :  { %v2748_v39 = vmul.f32 1.442695, %v2747_v30 }
0x31a8   :  { %3261 = vpow2.f32 %v2748_v39 }
0x31b5   :  { %v3262_v17 = vpop.eup %3261 }
0x31b6   :  { %2750 = vadd.xlane.f32.xlu0 %v3262_v17 }
0x323f   :  { %v2751_v18 = vpop.xlane.xlu0 %2750 }
0x3240   :  { %3263 = vlog2.f32 %v2751_v18 }
0x324d   :  { %v3264_v19 = vpop.eup %3263 }
0x324e   :  { %v2753_v10 = vmul.f32 0.6931472, %v3264_v19 }
0x3250   :  { %v2754_v12 = vadd.f32 %v2753_v10, %v2746_v16 }
0x3252   :  { %v2755_v21 = vsub.f32 %v2742_v11, %v2754_v12 }
0x3254   :  { %2756 = vst [vmem:[%s4083_s16] sm:$0xff] %v2755_v21 }

</bundles_post_ra>
